<compile_context>
chip_gen: v5e
topology: v5e:2x2
jax: 0.10.0
libtpu: 0.0.40
codegen_flags: <defaults>
</compile_context>

<pallas_src>
import numpy as np
import jax
import jax.numpy as jnp
from jax.experimental import pallas as pl
from jax.experimental.pallas import tpu as pltpu

_EPS = 1e-5
_PH = 2   # zero rows stored above/below the image (>=1 needed for conv pad, 2 keeps flat tap slices in-bounds)
_PW = 1   # zero cols stored left/right of the image


def _round8(c):
    return -(-c // 8) * 8


def _geom(h, w):
    """Padded-flat geometry for an h x w image."""
    hp, wp = h + 2 * _PH, w + 2 * _PW
    lt = hp * wp                          # logical padded-flat length
    lt_store = -(-lt // 128) * 128        # lane-dense storage length (multiple of 128)
    mid0 = _PH * wp                       # flat offset of the first image row
    lm = h * wp                           # length of the "middle" region (all image rows)
    return dict(h=h, w=w, hp=hp, wp=wp, lt=lt, lt_store=lt_store, mid0=mid0, lm=lm)


def _tap_offsets(g):
    """Flat slice offsets for the 9 taps of a 3x3 same conv in the padded-flat layout."""
    return [(_PH + di) * g["wp"] + dj for di in (-1, 0, 1) for dj in (-1, 0, 1)]


def _col_mask(g):
    """(1, lm) f32 mask: 1 on real image columns, 0 on the stored zero-pad columns."""
    c = jnp.arange(g["lm"]) % g["wp"]
    return ((c >= _PW) & (c < _PW + g["w"])).astype(jnp.float32).reshape(1, g["lm"])


def _selection_matrix(g_in, g_out, stride):
    """0/1 matrix (lm_in, lm_out): spatial stride-`stride` subsample as a matmul."""
    sel = np.zeros((g_in["lm"], g_out["lm"]), dtype=np.float32)
    for i in range(g_out["h"]):
        for j in range(g_out["w"]):
            q = i * g_out["wp"] + (_PW + j)
            p = (stride * i) * g_in["wp"] + (_PW + stride * j)
            sel[p, q] = 1.0
    return jnp.asarray(sel, dtype=jnp.bfloat16)


def _fold_bn(w, bn, cin_p, cout_p):
    """Fold eval-mode BN into the conv weight; return (cout_p, kh*kw*cin_p) bf16 + f32 bias."""
    kh, kw, cin, cout = w.shape
    gamma, beta, mean, var = bn
    scale = gamma / jnp.sqrt(var + _EPS)
    bias = beta - mean * scale
    wt = jnp.transpose(w, (3, 0, 1, 2)) * scale[:, None, None, None]   # (cout, kh, kw, cin)
    wt = jnp.pad(wt, ((0, cout_p - cout), (0, 0), (0, 0), (0, cin_p - cin)))
    w2 = wt.reshape(cout_p, kh * kw * cin_p).astype(jnp.bfloat16)
    b = jnp.pad(bias, (0, cout_p - cout)).reshape(cout_p, 1).astype(jnp.float32)
    return w2, b


# --------------------------------- fused BasicBlock kernel ---------------------------------

def _make_block_kernel(cout_p, g_in, g_out, stride):
    offs_in = _tap_offsets(g_in)
    offs_out = _tap_offsets(g_out)
    lm_in, lm_out = g_in["lm"], g_out["lm"]
    mid_in, mid_out = g_in["mid0"], g_out["mid0"]
    lt_out = g_out["lt_store"]
    bf16 = jnp.bfloat16

    def kernel(*refs):
        if stride == 1:
            (x_ref, w1_ref, b1_ref, w2_ref, b2_ref,
             wd_ref, bd_ref, mask_ref, o_ref, y1p_ref) = refs
            sel_ref = None
        else:
            (x_ref, w1_ref, b1_ref, w2_ref, b2_ref,
             wd_ref, bd_ref, mask_ref, sel_ref, o_ref, y1p_ref) = refs

        xv = x_ref[0]                       # (cin_p, lt_in) f32, zero-padded flat layout
        mask = mask_ref[...]                # (1, lm_out) f32

        # ---- conv1 (3x3) + bn1 + relu : ONE matmul with K = 9*cin_p ----
        taps1 = jnp.concatenate(
            [xv[:, o:o + lm_in] for o in offs_in], axis=0).astype(bf16)
        y1 = jnp.dot(w1_ref[...], taps1, preferred_element_type=jnp.float32)
        y1 = jnp.maximum(y1 + b1_ref[...], 0.0)                  # (cout_p, lm_in)

        # ---- 1x1 downsample branch (+ bn) on the block input ----
        x_mid = xv[:, mid_in:mid_in + lm_in]
        if stride == 1:
            y1_mid = y1 * mask               # keep zero padding columns exact for conv2
            idn = jnp.dot(wd_ref[...], x_mid.astype(bf16),
                          preferred_element_type=jnp.float32) + bd_ref[...]
        else:
            sel = sel_ref[...]               # (lm_in, lm_out) 0/1 selection
            y1_mid = jnp.dot(y1.astype(bf16), sel,
                             preferred_element_type=jnp.float32)
            xs = jnp.dot(x_mid.astype(bf16), sel,
                         preferred_element_type=jnp.float32)
            idn = jnp.dot(wd_ref[...], xs.astype(bf16),
                          preferred_element_type=jnp.float32) + bd_ref[...]

        # ---- re-embed y1 into the zero-padded flat layout (VMEM scratch) ----
        y1p_ref[...] = jnp.zeros((cout_p, lt_out), jnp.float32)
        y1p_ref[:, mid_out:mid_out + lm_out] = y1_mid

        # ---- conv2 (3x3) + bn2 + residual + relu : ONE matmul with K = 9*cout_p ----
        taps2 = jnp.concatenate(
            [y1p_ref[:, o:o + lm_out] for o in offs_out], axis=0).astype(bf16)
        y2 = jnp.dot(w2_ref[...], taps2, preferred_element_type=jnp.float32)
        out = jnp.maximum(y2 + b2_ref[...] + idn, 0.0) * mask

        # ---- write back in the same padded-flat layout (lane-dense full block) ----
        o_ref[0] = jnp.zeros((cout_p, lt_out), o_ref.dtype)
        o_ref[0, :, mid_out:mid_out + lm_out] = out.astype(o_ref.dtype)

    return kernel


def basic_block(x_flat, p, g_in, stride):
    """One fused torchvision-style BasicBlock (downsample branch always applied, as in the spec)."""
    n, cin_p, _ = x_flat.shape
    cout = p["w1"].shape[-1]
    cout_p = _round8(cout)
    g_out = g_in if stride == 1 else _geom(g_in["h"] // stride, g_in["w"] // stride)

    w1, b1 = _fold_bn(p["w1"], p["bn1"], cin_p, cout_p)
    w2, b2 = _fold_bn(p["w2"], p["bn2"], cout_p, cout_p)
    wd, bd = _fold_bn(p["wd"], p["bnd"], cin_p, cout_p)
    mask = _col_mask(g_out)

    inputs = [x_flat, w1, b1, w2, b2, wd, bd, mask]
    in_specs = [pl.BlockSpec((1, cin_p, g_in["lt_store"]), lambda i: (i, 0, 0))]
    in_specs += [pl.BlockSpec(a.shape, lambda i: (0, 0))
                 for a in (w1, b1, w2, b2, wd, bd, mask)]
    if stride != 1:
        sel = _selection_matrix(g_in, g_out, stride)
        inputs.append(sel)
        in_specs.append(pl.BlockSpec(sel.shape, lambda i: (0, 0)))

    kernel = _make_block_kernel(cout_p, g_in, g_out, stride)
    out = pl.pallas_call(
        kernel,
        out_shape=jax.ShapeDtypeStruct((n, cout_p, g_out["lt_store"]), jnp.float32),
        grid=(n,),
        in_specs=in_specs,
        out_specs=pl.BlockSpec((1, cout_p, g_out["lt_store"]), lambda i: (i, 0, 0)),
        scratch_shapes=[pltpu.VMEM((cout_p, g_out["lt_store"]), jnp.float32)],
        compiler_params=pltpu.CompilerParams(
            dimension_semantics=("parallel",),
            vmem_limit_bytes=32 * 1024 * 1024),
    )(*inputs)
    return out, g_out


def down_old_forward(x_nchw, params, stride=2):
    n, cin, h, w = x_nchw.shape
    assert h % stride == 0 and w % stride == 0
    cin_p = _round8(cin)
    g = _geom(h, w)

    # Embed NCHW input into the zero-padded flattened layout (single pad + reshape; no im2col).
    xp = jnp.pad(x_nchw.astype(jnp.float32),
                 ((0, 0), (0, cin_p - cin), (_PH, _PH), (_PW, _PW)))
    xf = xp.reshape(n, cin_p, g["lt"])
    xf = jnp.pad(xf, ((0, 0), (0, 0), (0, g["lt_store"] - g["lt"])))

    for p in params["conv_blocks"]:                      # self.conv : stride-1 blocks
        xf, g = basic_block(xf, p, g, stride=1)
    xf, g = basic_block(xf, params["down_block"], g, stride=stride)   # self.down

    cout = params["down_block"]["w1"].shape[-1]
    out = xf[:, :, :g["lt"]].reshape(n, xf.shape[1], g["hp"], g["wp"])
    return out[:, :cout, _PH:_PH + g["h"], _PW:_PW + g["w"]]          # NCHW


# ------------------------ deterministic parameter init (synthetic) ------------------------

def _init_bn(key, c):
    k1, k2, k3, k4 = jax.random.split(key, 4)
    gamma = jax.random.uniform(k1, (c,), minval=0.5, maxval=1.5, dtype=jnp.float32)
    beta = 0.1 * jax.random.normal(k2, (c,), dtype=jnp.float32)
    mean = 0.1 * jax.random.normal(k3, (c,), dtype=jnp.float32)
    var = jax.random.uniform(k4, (c,), minval=0.5, maxval=1.5, dtype=jnp.float32)
    return gamma, beta, mean, var


def _init_conv(key, kh, kw, cin, cout):
    fan_in = float(kh * kw * cin)
    return jax.random.normal(key, (kh, kw, cin, cout), dtype=jnp.float32) / jnp.sqrt(fan_in)


def _init_basic_block(key, cin, cout):
    ks = jax.random.split(key, 6)
    return {
        "w1": _init_conv(ks[0], 3, 3, cin, cout),
        "bn1": _init_bn(ks[1], cout),
        "w2": _init_conv(ks[2], 3, 3, cout, cout),
        "bn2": _init_bn(ks[3], cout),
        "wd": _init_conv(ks[4], 1, 1, cin, cout),   # conv1x1 downsample / condense
        "bnd": _init_bn(ks[5], cout),
    }


def init_down_old(key, in_planes, out_planes, num_blocks):
    # NOTE: PyTorch shares one `condense` module across the conv blocks; with
    # num_blocks=2 there is exactly one conv block, so sharing is irrelevant.
    keys = jax.random.split(key, num_blocks)
    conv_blocks = [_init_basic_block(keys[i], in_planes, out_planes)
                   for i in range(num_blocks - 1)]
    down_block = _init_basic_block(keys[-1], out_planes, out_planes)
    return {"conv_blocks": conv_blocks, "down_block": down_block}


# --------------------------- pure-JAX reference (for a sanity check) ---------------------------

def _bn_eval(x, bn):
    gamma, beta, mean, var = bn
    inv = gamma / jnp.sqrt(var + _EPS)
    return x * inv[None, :, None, None] + (beta - mean * inv)[None, :, None, None]


def _ref_conv(x, w, stride):
    kh, kw = w.shape[0], w.shape[1]
    return jax.lax.conv_general_dilated(
        x, jnp.transpose(w, (3, 2, 0, 1)),
        window_strides=(stride, stride),
        padding=[((kh - 1) // 2,) * 2, ((kw - 1) // 2,) * 2],
        dimension_numbers=("NCHW", "OIHW", "NCHW"))


def _ref_block(x, p, stride):
    y = jnp.maximum(_bn_eval(_ref_conv(x, p["w1"], stride), p["bn1"]), 0.0)
    y = _bn_eval(_ref_conv(y, p["w2"], 1), p["bn2"])
    idn = _bn_eval(_ref_conv(x, p["wd"], stride), p["bnd"])
    return jnp.maximum(y + idn, 0.0)


def _ref_forward(x, params, stride=2):
    for p in params["conv_blocks"]:
        x = _ref_block(x, p, 1)
    return _ref_block(x, params["down_block"], stride)


if __name__ == "__main__":
    key = jax.random.PRNGKey(0)
    kx, kp = jax.random.split(key)
    in_planes, out_planes, num_blocks, stride = 4, 8, 2, 2
    x = jax.random.normal(kx, (2, in_planes, 16, 16), dtype=jnp.float32)  # NCHW like PyTorch
    params = init_down_old(kp, in_planes, out_planes, num_blocks)

    fwd = jax.jit(down_old_forward, static_argnames="stride")
    out = jax.block_until_ready(fwd(x, params, stride=stride))
    assert out.shape == (2, out_planes, 16 // stride, 16 // stride), out.shape
    assert bool(jnp.all(jnp.isfinite(out)))

    ref = _ref_forward(x, params, stride)
    err = float(jnp.max(jnp.abs(out - ref)))
    tol = 1e-1 * (1.0 + float(jnp.max(jnp.abs(ref))))   # loose: bf16 MXU operands vs f32 reference
    assert err <= tol, (err, tol)
    print("KERNEL_OK")
</pallas_src>

<mosaic_0001>
module attributes {stable_mosaic.version = 11 : i64} {
  func.func @kernel(%arg0: i32, %arg1: memref<1x8x384xf32, #tpu.memory_space<vmem>>, %arg2: memref<8x72xbf16, #tpu.memory_space<vmem>>, %arg3: memref<8x1xf32, #tpu.memory_space<vmem>>, %arg4: memref<8x72xbf16, #tpu.memory_space<vmem>>, %arg5: memref<8x1xf32, #tpu.memory_space<vmem>>, %arg6: memref<8x8xbf16, #tpu.memory_space<vmem>>, %arg7: memref<8x1xf32, #tpu.memory_space<vmem>>, %arg8: memref<1x80xf32, #tpu.memory_space<vmem>>, %arg9: memref<288x80xbf16, #tpu.memory_space<vmem>>, %arg10: memref<1x8x128xf32, #tpu.memory_space<vmem>>, %arg11: memref<8x128xf32, #tpu.memory_space<vmem>>) attributes {dimension_semantics = [#tpu.dimension_semantics<parallel>], iteration_bounds = array<i64: 2>, scalar_prefetch = 0 : i64, scratch_operands = 1 : i64, tpu.core_type = #tpu.core_type<tc>, window_params = [{transform_indices = @transform_0, window_bounds = array<i64: 1, 8, 384>}, {pipeline_mode = #tpu.pipeline_mode<synchronous>, transform_indices = @transform_1, window_bounds = array<i64: 8, 72>}, {pipeline_mode = #tpu.pipeline_mode<synchronous>, transform_indices = @transform_2, window_bounds = array<i64: 8, 1>}, {pipeline_mode = #tpu.pipeline_mode<synchronous>, transform_indices = @transform_3, window_bounds = array<i64: 8, 72>}, {pipeline_mode = #tpu.pipeline_mode<synchronous>, transform_indices = @transform_4, window_bounds = array<i64: 8, 1>}, {pipeline_mode = #tpu.pipeline_mode<synchronous>, transform_indices = @transform_5, window_bounds = array<i64: 8, 8>}, {pipeline_mode = #tpu.pipeline_mode<synchronous>, transform_indices = @transform_6, window_bounds = array<i64: 8, 1>}, {pipeline_mode = #tpu.pipeline_mode<synchronous>, transform_indices = @transform_7, window_bounds = array<i64: 1, 80>}, {pipeline_mode = #tpu.pipeline_mode<synchronous>, transform_indices = @transform_8, window_bounds = array<i64: 288, 80>}, {transform_indices = @transform_9, window_bounds = array<i64: 1, 8, 128>}]} {
    %c0 = arith.constant 0 : index
    %c0_0 = arith.constant 0 : index
    %c0_1 = arith.constant 0 : index
    %0 = vector.load %arg1[%c0, %c0_0, %c0_1] : memref<1x8x384xf32, #tpu.memory_space<vmem>>, vector<1x8x384xf32>
    %1 = vector.shape_cast %0 : vector<1x8x384xf32> to vector<8x384xf32>
    %c0_2 = arith.constant 0 : index
    %c0_3 = arith.constant 0 : index
    %2 = vector.load %arg8[%c0_2, %c0_3] : memref<1x80xf32, #tpu.memory_space<vmem>>, vector<1x80xf32>
    %3 = vector.extract_strided_slice %1 {offsets = [0, 17], sizes = [8, 288], strides = [1, 1]} : vector<8x384xf32> to vector<8x288xf32>
    %4 = vector.extract_strided_slice %1 {offsets = [0, 18], sizes = [8, 288], strides = [1, 1]} : vector<8x384xf32> to vector<8x288xf32>
    %5 = vector.extract_strided_slice %1 {offsets = [0, 19], sizes = [8, 288], strides = [1, 1]} : vector<8x384xf32> to vector<8x288xf32>
    %6 = vector.extract_strided_slice %1 {offsets = [0, 35], sizes = [8, 288], strides = [1, 1]} : vector<8x384xf32> to vector<8x288xf32>
    %7 = vector.extract_strided_slice %1 {offsets = [0, 36], sizes = [8, 288], strides = [1, 1]} : vector<8x384xf32> to vector<8x288xf32>
    %8 = vector.extract_strided_slice %1 {offsets = [0, 37], sizes = [8, 288], strides = [1, 1]} : vector<8x384xf32> to vector<8x288xf32>
    %9 = vector.extract_strided_slice %1 {offsets = [0, 53], sizes = [8, 288], strides = [1, 1]} : vector<8x384xf32> to vector<8x288xf32>
    %10 = vector.extract_strided_slice %1 {offsets = [0, 54], sizes = [8, 288], strides = [1, 1]} : vector<8x384xf32> to vector<8x288xf32>
    %11 = vector.extract_strided_slice %1 {offsets = [0, 55], sizes = [8, 288], strides = [1, 1]} : vector<8x384xf32> to vector<8x288xf32>
    %12 = tpu.concatenate %3, %4, %5, %6, %7, %8, %9, %10, %11 in 0 : vector<8x288xf32>, vector<8x288xf32>, vector<8x288xf32>, vector<8x288xf32>, vector<8x288xf32>, vector<8x288xf32>, vector<8x288xf32>, vector<8x288xf32>, vector<8x288xf32> -> vector<72x288xf32>
    %13 = arith.truncf %12 : vector<72x288xf32> to vector<72x288xbf16>
    %c0_4 = arith.constant 0 : index
    %c0_5 = arith.constant 0 : index
    %14 = vector.load %arg2[%c0_4, %c0_5] : memref<8x72xbf16, #tpu.memory_space<vmem>>, vector<8x72xbf16>
    %cst = arith.constant dense<0.000000e+00> : vector<8x288xf32>
    %15 = tpu.matmul %14, %13, %cst {dimension_numbers = #tpu.dot_dimension_numbers<[1], [0], [0], [1], [0, 0, 1, 1], [], []>} : vector<8x72xbf16>, vector<72x288xbf16>, vector<8x288xf32> -> vector<8x288xf32>
    %c0_6 = arith.constant 0 : index
    %c0_7 = arith.constant 0 : index
    %16 = vector.load %arg3[%c0_6, %c0_7] : memref<8x1xf32, #tpu.memory_space<vmem>>, vector<8x1xf32>
    %17 = vector.broadcast %16 : vector<8x1xf32> to vector<8x288xf32>
    %18 = arith.addf %15, %17 : vector<8x288xf32>
    %cst_8 = arith.constant 0.000000e+00 : f32
    %19 = vector.broadcast %cst_8 : f32 to vector<8x288xf32>
    %20 = arith.maximumf %18, %19 : vector<8x288xf32>
    %21 = vector.extract_strided_slice %1 {offsets = [0, 36], sizes = [8, 288], strides = [1, 1]} : vector<8x384xf32> to vector<8x288xf32>
    %c0_9 = arith.constant 0 : index
    %c0_10 = arith.constant 0 : index
    %22 = vector.load %arg9[%c0_9, %c0_10] : memref<288x80xbf16, #tpu.memory_space<vmem>>, vector<288x80xbf16>
    %23 = arith.truncf %20 : vector<8x288xf32> to vector<8x288xbf16>
    %cst_11 = arith.constant dense<0.000000e+00> : vector<8x80xf32>
    %24 = tpu.matmul %23, %22, %cst_11 {dimension_numbers = #tpu.dot_dimension_numbers<[1], [0], [0], [1], [0, 0, 1, 1], [], []>} : vector<8x288xbf16>, vector<288x80xbf16>, vector<8x80xf32> -> vector<8x80xf32>
    %25 = arith.truncf %21 : vector<8x288xf32> to vector<8x288xbf16>
    %cst_12 = arith.constant dense<0.000000e+00> : vector<8x80xf32>
    %26 = tpu.matmul %25, %22, %cst_12 {dimension_numbers = #tpu.dot_dimension_numbers<[1], [0], [0], [1], [0, 0, 1, 1], [], []>} : vector<8x288xbf16>, vector<288x80xbf16>, vector<8x80xf32> -> vector<8x80xf32>
    %c0_13 = arith.constant 0 : index
    %c0_14 = arith.constant 0 : index
    %27 = vector.load %arg6[%c0_13, %c0_14] : memref<8x8xbf16, #tpu.memory_space<vmem>>, vector<8x8xbf16>
    %28 = arith.truncf %26 : vector<8x80xf32> to vector<8x80xbf16>
    %cst_15 = arith.constant dense<0.000000e+00> : vector<8x80xf32>
    %29 = tpu.matmul %27, %28, %cst_15 {dimension_numbers = #tpu.dot_dimension_numbers<[1], [0], [0], [1], [0, 0, 1, 1], [], []>} : vector<8x8xbf16>, vector<8x80xbf16>, vector<8x80xf32> -> vector<8x80xf32>
    %c0_16 = arith.constant 0 : index
    %c0_17 = arith.constant 0 : index
    %30 = vector.load %arg7[%c0_16, %c0_17] : memref<8x1xf32, #tpu.memory_space<vmem>>, vector<8x1xf32>
    %31 = vector.broadcast %30 : vector<8x1xf32> to vector<8x80xf32>
    %32 = arith.addf %29, %31 : vector<8x80xf32>
    %cst_18 = arith.constant 0.000000e+00 : f32
    %33 = vector.broadcast %cst_18 : f32 to vector<8x128xf32>
    %c0_19 = arith.constant 0 : index
    %c0_20 = arith.constant 0 : index
    %34 = vector.load %arg11[%c0_19, %c0_20] : memref<8x128xf32, #tpu.memory_space<vmem>>, vector<8x128xf32>
    tpu.vector_store %arg11[%c0_19, %c0_20], %33 {strides = array<i32>} : memref<8x128xf32, #tpu.memory_space<vmem>>, vector<8x128xf32>,
    %c0_21 = arith.constant 0 : index
    %c20 = arith.constant 20 : index
    %35 = vector.load %arg11[%c0_21, %c20] : memref<8x128xf32, #tpu.memory_space<vmem>>, vector<8x80xf32>
    tpu.vector_store %arg11[%c0_21, %c20], %24 {strides = array<i32>} : memref<8x128xf32, #tpu.memory_space<vmem>>, vector<8x80xf32>,
    %c0_22 = arith.constant 0 : index
    %c9 = arith.constant 9 : index
    %36 = vector.load %arg11[%c0_22, %c9] : memref<8x128xf32, #tpu.memory_space<vmem>>, vector<8x80xf32>
    %c0_23 = arith.constant 0 : index
    %c10 = arith.constant 10 : index
    %37 = vector.load %arg11[%c0_23, %c10] : memref<8x128xf32, #tpu.memory_space<vmem>>, vector<8x80xf32>
    %c0_24 = arith.constant 0 : index
    %c11 = arith.constant 11 : index
    %38 = vector.load %arg11[%c0_24, %c11] : memref<8x128xf32, #tpu.memory_space<vmem>>, vector<8x80xf32>
    %c0_25 = arith.constant 0 : index
    %c19 = arith.constant 19 : index
    %39 = vector.load %arg11[%c0_25, %c19] : memref<8x128xf32, #tpu.memory_space<vmem>>, vector<8x80xf32>
    %c0_26 = arith.constant 0 : index
    %c20_27 = arith.constant 20 : index
    %40 = vector.load %arg11[%c0_26, %c20_27] : memref<8x128xf32, #tpu.memory_space<vmem>>, vector<8x80xf32>
    %c0_28 = arith.constant 0 : index
    %c21 = arith.constant 21 : index
    %41 = vector.load %arg11[%c0_28, %c21] : memref<8x128xf32, #tpu.memory_space<vmem>>, vector<8x80xf32>
    %c0_29 = arith.constant 0 : index
    %c29 = arith.constant 29 : index
    %42 = vector.load %arg11[%c0_29, %c29] : memref<8x128xf32, #tpu.memory_space<vmem>>, vector<8x80xf32>
    %c0_30 = arith.constant 0 : index
    %c30 = arith.constant 30 : index
    %43 = vector.load %arg11[%c0_30, %c30] : memref<8x128xf32, #tpu.memory_space<vmem>>, vector<8x80xf32>
    %c0_31 = arith.constant 0 : index
    %c31 = arith.constant 31 : index
    %44 = vector.load %arg11[%c0_31, %c31] : memref<8x128xf32, #tpu.memory_space<vmem>>, vector<8x80xf32>
    %45 = tpu.concatenate %36, %37, %38, %39, %40, %41, %42, %43, %44 in 0 : vector<8x80xf32>, vector<8x80xf32>, vector<8x80xf32>, vector<8x80xf32>, vector<8x80xf32>, vector<8x80xf32>, vector<8x80xf32>, vector<8x80xf32>, vector<8x80xf32> -> vector<72x80xf32>
    %46 = arith.truncf %45 : vector<72x80xf32> to vector<72x80xbf16>
    %c0_32 = arith.constant 0 : index
    %c0_33 = arith.constant 0 : index
    %47 = vector.load %arg4[%c0_32, %c0_33] : memref<8x72xbf16, #tpu.memory_space<vmem>>, vector<8x72xbf16>
    %cst_34 = arith.constant dense<0.000000e+00> : vector<8x80xf32>
    %48 = tpu.matmul %47, %46, %cst_34 {dimension_numbers = #tpu.dot_dimension_numbers<[1], [0], [0], [1], [0, 0, 1, 1], [], []>} : vector<8x72xbf16>, vector<72x80xbf16>, vector<8x80xf32> -> vector<8x80xf32>
    %c0_35 = arith.constant 0 : index
    %c0_36 = arith.constant 0 : index
    %49 = vector.load %arg5[%c0_35, %c0_36] : memref<8x1xf32, #tpu.memory_space<vmem>>, vector<8x1xf32>
    %50 = vector.broadcast %49 : vector<8x1xf32> to vector<8x80xf32>
    %51 = arith.addf %48, %50 : vector<8x80xf32>
    %52 = arith.addf %51, %32 : vector<8x80xf32>
    %cst_37 = arith.constant 0.000000e+00 : f32
    %53 = vector.broadcast %cst_37 : f32 to vector<8x80xf32>
    %54 = arith.maximumf %52, %53 : vector<8x80xf32>
    %55 = vector.broadcast %2 : vector<1x80xf32> to vector<8x80xf32>
    %56 = arith.mulf %54, %55 : vector<8x80xf32>
    %cst_38 = arith.constant 0.000000e+00 : f32
    %57 = vector.broadcast %cst_38 : f32 to vector<8x128xf32>
    %c0_39 = arith.constant 0 : index
    %c0_40 = arith.constant 0 : index
    %c0_41 = arith.constant 0 : index
    %58 = vector.load %arg10[%c0_39, %c0_40, %c0_41] : memref<1x8x128xf32, #tpu.memory_space<vmem>>, vector<1x8x128xf32>
    %59 = vector.shape_cast %58 : vector<1x8x128xf32> to vector<8x128xf32>
    %60 = vector.shape_cast %57 : vector<8x128xf32> to vector<1x8x128xf32>
    tpu.vector_store %arg10[%c0_39, %c0_40, %c0_41], %60 {strides = array<i32>} : memref<1x8x128xf32, #tpu.memory_space<vmem>>, vector<1x8x128xf32>,
    %c0_42 = arith.constant 0 : index
    %c0_43 = arith.constant 0 : index
    %c20_44 = arith.constant 20 : index
    %61 = vector.load %arg10[%c0_42, %c0_43, %c20_44] : memref<1x8x128xf32, #tpu.memory_space<vmem>>, vector<1x8x80xf32>
    %62 = vector.shape_cast %61 : vector<1x8x80xf32> to vector<8x80xf32>
    %63 = vector.shape_cast %56 : vector<8x80xf32> to vector<1x8x80xf32>
    tpu.vector_store %arg10[%c0_42, %c0_43, %c20_44], %63 {strides = array<i32>} : memref<1x8x128xf32, #tpu.memory_space<vmem>>, vector<1x8x80xf32>,
    return
  }
  func.func @transform_0(%arg0: i32) -> (i32, i32, i32) {
    %c0_i32 = arith.constant 0 : i32
    %c0_i32_0 = arith.constant 0 : i32
    %c0_i32_1 = arith.constant 0 : i32
    return %arg0, %c0_i32, %c0_i32_0 : i32, i32, i32
  }
  func.func @transform_1(%arg0: i32) -> (i32, i32) {
    %c0_i32 = arith.constant 0 : i32
    %c0_i32_0 = arith.constant 0 : i32
    %c0_i32_1 = arith.constant 0 : i32
    return %c0_i32, %c0_i32_0 : i32, i32
  }
  func.func @transform_2(%arg0: i32) -> (i32, i32) {
    %c0_i32 = arith.constant 0 : i32
    %c0_i32_0 = arith.constant 0 : i32
    %c0_i32_1 = arith.constant 0 : i32
    return %c0_i32, %c0_i32_0 : i32, i32
  }
  func.func @transform_3(%arg0: i32) -> (i32, i32) {
    %c0_i32 = arith.constant 0 : i32
    %c0_i32_0 = arith.constant 0 : i32
    %c0_i32_1 = arith.constant 0 : i32
    return %c0_i32, %c0_i32_0 : i32, i32
  }
  func.func @transform_4(%arg0: i32) -> (i32, i32) {
    %c0_i32 = arith.constant 0 : i32
    %c0_i32_0 = arith.constant 0 : i32
    %c0_i32_1 = arith.constant 0 : i32
    return %c0_i32, %c0_i32_0 : i32, i32
  }
  func.func @transform_5(%arg0: i32) -> (i32, i32) {
    %c0_i32 = arith.constant 0 : i32
    %c0_i32_0 = arith.constant 0 : i32
    %c0_i32_1 = arith.constant 0 : i32
    return %c0_i32, %c0_i32_0 : i32, i32
  }
  func.func @transform_6(%arg0: i32) -> (i32, i32) {
    %c0_i32 = arith.constant 0 : i32
    %c0_i32_0 = arith.constant 0 : i32
    %c0_i32_1 = arith.constant 0 : i32
    return %c0_i32, %c0_i32_0 : i32, i32
  }
  func.func @transform_7(%arg0: i32) -> (i32, i32) {
    %c0_i32 = arith.constant 0 : i32
    %c0_i32_0 = arith.constant 0 : i32
    %c0_i32_1 = arith.constant 0 : i32
    return %c0_i32, %c0_i32_0 : i32, i32
  }
  func.func @transform_8(%arg0: i32) -> (i32, i32) {
    %c0_i32 = arith.constant 0 : i32
    %c0_i32_0 = arith.constant 0 : i32
    %c0_i32_1 = arith.constant 0 : i32
    return %c0_i32, %c0_i32_0 : i32, i32
  }
  func.func @transform_9(%arg0: i32) -> (i32, i32, i32) {
    %c0_i32 = arith.constant 0 : i32
    %c0_i32_0 = arith.constant 0 : i32
    %c0_i32_1 = arith.constant 0 : i32
    return %arg0, %c0_i32, %c0_i32_0 : i32, i32, i32
  }
}

module attributes {stable_mosaic.version = 11 : i64} {
  func.func @kernel(%arg0: i32, %arg1: memref<1x8x384xf32, #tpu.memory_space<vmem>>, %arg2: memref<8x72xbf16, #tpu.memory_space<vmem>>, %arg3: memref<8x1xf32, #tpu.memory_space<vmem>>, %arg4: memref<8x72xbf16, #tpu.memory_space<vmem>>, %arg5: memref<8x1xf32, #tpu.memory_space<vmem>>, %arg6: memref<8x8xbf16, #tpu.memory_space<vmem>>, %arg7: memref<8x1xf32, #tpu.memory_space<vmem>>, %arg8: memref<1x288xf32, #tpu.memory_space<vmem>>, %arg9: memref<1x8x384xf32, #tpu.memory_space<vmem>>, %arg10: memref<8x384xf32, #tpu.memory_space<vmem>>) attributes {dimension_semantics = [#tpu.dimension_semantics<parallel>], iteration_bounds = array<i64: 2>, scalar_prefetch = 0 : i64, scratch_operands = 1 : i64, tpu.core_type = #tpu.core_type<tc>, window_params = [{transform_indices = @transform_0, window_bounds = array<i64: 1, 8, 384>}, {pipeline_mode = #tpu.pipeline_mode<synchronous>, transform_indices = @transform_1, window_bounds = array<i64: 8, 72>}, {pipeline_mode = #tpu.pipeline_mode<synchronous>, transform_indices = @transform_2, window_bounds = array<i64: 8, 1>}, {pipeline_mode = #tpu.pipeline_mode<synchronous>, transform_indices = @transform_3, window_bounds = array<i64: 8, 72>}, {pipeline_mode = #tpu.pipeline_mode<synchronous>, transform_indices = @transform_4, window_bounds = array<i64: 8, 1>}, {pipeline_mode = #tpu.pipeline_mode<synchronous>, transform_indices = @transform_5, window_bounds = array<i64: 8, 8>}, {pipeline_mode = #tpu.pipeline_mode<synchronous>, transform_indices = @transform_6, window_bounds = array<i64: 8, 1>}, {pipeline_mode = #tpu.pipeline_mode<synchronous>, transform_indices = @transform_7, window_bounds = array<i64: 1, 288>}, {transform_indices = @transform_8, window_bounds = array<i64: 1, 8, 384>}]} {
    %c0 = arith.constant 0 : index
    %c0_0 = arith.constant 0 : index
    %c0_1 = arith.constant 0 : index
    %0 = vector.load %arg1[%c0, %c0_0, %c0_1] : memref<1x8x384xf32, #tpu.memory_space<vmem>>, vector<1x8x384xf32>
    %1 = vector.shape_cast %0 : vector<1x8x384xf32> to vector<8x384xf32>
    %c0_2 = arith.constant 0 : index
    %c0_3 = arith.constant 0 : index
    %2 = vector.load %arg8[%c0_2, %c0_3] : memref<1x288xf32, #tpu.memory_space<vmem>>, vector<1x288xf32>
    %3 = vector.extract_strided_slice %1 {offsets = [0, 17], sizes = [8, 288], strides = [1, 1]} : vector<8x384xf32> to vector<8x288xf32>
    %4 = vector.extract_strided_slice %1 {offsets = [0, 18], sizes = [8, 288], strides = [1, 1]} : vector<8x384xf32> to vector<8x288xf32>
    %5 = vector.extract_strided_slice %1 {offsets = [0, 19], sizes = [8, 288], strides = [1, 1]} : vector<8x384xf32> to vector<8x288xf32>
    %6 = vector.extract_strided_slice %1 {offsets = [0, 35], sizes = [8, 288], strides = [1, 1]} : vector<8x384xf32> to vector<8x288xf32>
    %7 = vector.extract_strided_slice %1 {offsets = [0, 36], sizes = [8, 288], strides = [1, 1]} : vector<8x384xf32> to vector<8x288xf32>
    %8 = vector.extract_strided_slice %1 {offsets = [0, 37], sizes = [8, 288], strides = [1, 1]} : vector<8x384xf32> to vector<8x288xf32>
    %9 = vector.extract_strided_slice %1 {offsets = [0, 53], sizes = [8, 288], strides = [1, 1]} : vector<8x384xf32> to vector<8x288xf32>
    %10 = vector.extract_strided_slice %1 {offsets = [0, 54], sizes = [8, 288], strides = [1, 1]} : vector<8x384xf32> to vector<8x288xf32>
    %11 = vector.extract_strided_slice %1 {offsets = [0, 55], sizes = [8, 288], strides = [1, 1]} : vector<8x384xf32> to vector<8x288xf32>
    %12 = tpu.concatenate %3, %4, %5, %6, %7, %8, %9, %10, %11 in 0 : vector<8x288xf32>, vector<8x288xf32>, vector<8x288xf32>, vector<8x288xf32>, vector<8x288xf32>, vector<8x288xf32>, vector<8x288xf32>, vector<8x288xf32>, vector<8x288xf32> -> vector<72x288xf32>
    %13 = arith.truncf %12 : vector<72x288xf32> to vector<72x288xbf16>
    %c0_4 = arith.constant 0 : index
    %c0_5 = arith.constant 0 : index
    %14 = vector.load %arg2[%c0_4, %c0_5] : memref<8x72xbf16, #tpu.memory_space<vmem>>, vector<8x72xbf16>
    %cst = arith.constant dense<0.000000e+00> : vector<8x288xf32>
    %15 = tpu.matmul %14, %13, %cst {dimension_numbers = #tpu.dot_dimension_numbers<[1], [0], [0], [1], [0, 0, 1, 1], [], []>} : vector<8x72xbf16>, vector<72x288xbf16>, vector<8x288xf32> -> vector<8x288xf32>
    %c0_6 = arith.constant 0 : index
    %c0_7 = arith.constant 0 : index
    %16 = vector.load %arg3[%c0_6, %c0_7] : memref<8x1xf32, #tpu.memory_space<vmem>>, vector<8x1xf32>
    %17 = vector.broadcast %16 : vector<8x1xf32> to vector<8x288xf32>
    %18 = arith.addf %15, %17 : vector<8x288xf32>
    %cst_8 = arith.constant 0.000000e+00 : f32
    %19 = vector.broadcast %cst_8 : f32 to vector<8x288xf32>
    %20 = arith.maximumf %18, %19 : vector<8x288xf32>
    %21 = vector.extract_strided_slice %1 {offsets = [0, 36], sizes = [8, 288], strides = [1, 1]} : vector<8x384xf32> to vector<8x288xf32>
    %22 = vector.broadcast %2 : vector<1x288xf32> to vector<8x288xf32>
    %23 = arith.mulf %20, %22 : vector<8x288xf32>
    %c0_9 = arith.constant 0 : index
    %c0_10 = arith.constant 0 : index
    %24 = vector.load %arg6[%c0_9, %c0_10] : memref<8x8xbf16, #tpu.memory_space<vmem>>, vector<8x8xbf16>
    %25 = arith.truncf %21 : vector<8x288xf32> to vector<8x288xbf16>
    %cst_11 = arith.constant dense<0.000000e+00> : vector<8x288xf32>
    %26 = tpu.matmul %24, %25, %cst_11 {dimension_numbers = #tpu.dot_dimension_numbers<[1], [0], [0], [1], [0, 0, 1, 1], [], []>} : vector<8x8xbf16>, vector<8x288xbf16>, vector<8x288xf32> -> vector<8x288xf32>
    %c0_12 = arith.constant 0 : index
    %c0_13 = arith.constant 0 : index
    %27 = vector.load %arg7[%c0_12, %c0_13] : memref<8x1xf32, #tpu.memory_space<vmem>>, vector<8x1xf32>
    %28 = vector.broadcast %27 : vector<8x1xf32> to vector<8x288xf32>
    %29 = arith.addf %26, %28 : vector<8x288xf32>
    %cst_14 = arith.constant 0.000000e+00 : f32
    %30 = vector.broadcast %cst_14 : f32 to vector<8x384xf32>
    %c0_15 = arith.constant 0 : index
    %c0_16 = arith.constant 0 : index
    %31 = vector.load %arg10[%c0_15, %c0_16] : memref<8x384xf32, #tpu.memory_space<vmem>>, vector<8x384xf32>
    tpu.vector_store %arg10[%c0_15, %c0_16], %30 {strides = array<i32>} : memref<8x384xf32, #tpu.memory_space<vmem>>, vector<8x384xf32>,
    %c0_17 = arith.constant 0 : index
    %c36 = arith.constant 36 : index
    %32 = vector.load %arg10[%c0_17, %c36] : memref<8x384xf32, #tpu.memory_space<vmem>>, vector<8x288xf32>
    tpu.vector_store %arg10[%c0_17, %c36], %23 {strides = array<i32>} : memref<8x384xf32, #tpu.memory_space<vmem>>, vector<8x288xf32>,
    %c0_18 = arith.constant 0 : index
    %c17 = arith.constant 17 : index
    %33 = vector.load %arg10[%c0_18, %c17] : memref<8x384xf32, #tpu.memory_space<vmem>>, vector<8x288xf32>
    %c0_19 = arith.constant 0 : index
    %c18 = arith.constant 18 : index
    %34 = vector.load %arg10[%c0_19, %c18] : memref<8x384xf32, #tpu.memory_space<vmem>>, vector<8x288xf32>
    %c0_20 = arith.constant 0 : index
    %c19 = arith.constant 19 : index
    %35 = vector.load %arg10[%c0_20, %c19] : memref<8x384xf32, #tpu.memory_space<vmem>>, vector<8x288xf32>
    %c0_21 = arith.constant 0 : index
    %c35 = arith.constant 35 : index
    %36 = vector.load %arg10[%c0_21, %c35] : memref<8x384xf32, #tpu.memory_space<vmem>>, vector<8x288xf32>
    %c0_22 = arith.constant 0 : index
    %c36_23 = arith.constant 36 : index
    %37 = vector.load %arg10[%c0_22, %c36_23] : memref<8x384xf32, #tpu.memory_space<vmem>>, vector<8x288xf32>
    %c0_24 = arith.constant 0 : index
    %c37 = arith.constant 37 : index
    %38 = vector.load %arg10[%c0_24, %c37] : memref<8x384xf32, #tpu.memory_space<vmem>>, vector<8x288xf32>
    %c0_25 = arith.constant 0 : index
    %c53 = arith.constant 53 : index
    %39 = vector.load %arg10[%c0_25, %c53] : memref<8x384xf32, #tpu.memory_space<vmem>>, vector<8x288xf32>
    %c0_26 = arith.constant 0 : index
    %c54 = arith.constant 54 : index
    %40 = vector.load %arg10[%c0_26, %c54] : memref<8x384xf32, #tpu.memory_space<vmem>>, vector<8x288xf32>
    %c0_27 = arith.constant 0 : index
    %c55 = arith.constant 55 : index
    %41 = vector.load %arg10[%c0_27, %c55] : memref<8x384xf32, #tpu.memory_space<vmem>>, vector<8x288xf32>
    %42 = tpu.concatenate %33, %34, %35, %36, %37, %38, %39, %40, %41 in 0 : vector<8x288xf32>, vector<8x288xf32>, vector<8x288xf32>, vector<8x288xf32>, vector<8x288xf32>, vector<8x288xf32>, vector<8x288xf32>, vector<8x288xf32>, vector<8x288xf32> -> vector<72x288xf32>
    %43 = arith.truncf %42 : vector<72x288xf32> to vector<72x288xbf16>
    %c0_28 = arith.constant 0 : index
    %c0_29 = arith.constant 0 : index
    %44 = vector.load %arg4[%c0_28, %c0_29] : memref<8x72xbf16, #tpu.memory_space<vmem>>, vector<8x72xbf16>
    %cst_30 = arith.constant dense<0.000000e+00> : vector<8x288xf32>
    %45 = tpu.matmul %44, %43, %cst_30 {dimension_numbers = #tpu.dot_dimension_numbers<[1], [0], [0], [1], [0, 0, 1, 1], [], []>} : vector<8x72xbf16>, vector<72x288xbf16>, vector<8x288xf32> -> vector<8x288xf32>
    %c0_31 = arith.constant 0 : index
    %c0_32 = arith.constant 0 : index
    %46 = vector.load %arg5[%c0_31, %c0_32] : memref<8x1xf32, #tpu.memory_space<vmem>>, vector<8x1xf32>
    %47 = vector.broadcast %46 : vector<8x1xf32> to vector<8x288xf32>
    %48 = arith.addf %45, %47 : vector<8x288xf32>
    %49 = arith.addf %48, %29 : vector<8x288xf32>
    %cst_33 = arith.constant 0.000000e+00 : f32
    %50 = vector.broadcast %cst_33 : f32 to vector<8x288xf32>
    %51 = arith.maximumf %49, %50 : vector<8x288xf32>
    %52 = vector.broadcast %2 : vector<1x288xf32> to vector<8x288xf32>
    %53 = arith.mulf %51, %52 : vector<8x288xf32>
    %cst_34 = arith.constant 0.000000e+00 : f32
    %54 = vector.broadcast %cst_34 : f32 to vector<8x384xf32>
    %c0_35 = arith.constant 0 : index
    %c0_36 = arith.constant 0 : index
    %c0_37 = arith.constant 0 : index
    %55 = vector.load %arg9[%c0_35, %c0_36, %c0_37] : memref<1x8x384xf32, #tpu.memory_space<vmem>>, vector<1x8x384xf32>
    %56 = vector.shape_cast %55 : vector<1x8x384xf32> to vector<8x384xf32>
    %57 = vector.shape_cast %54 : vector<8x384xf32> to vector<1x8x384xf32>
    tpu.vector_store %arg9[%c0_35, %c0_36, %c0_37], %57 {strides = array<i32>} : memref<1x8x384xf32, #tpu.memory_space<vmem>>, vector<1x8x384xf32>,
    %c0_38 = arith.constant 0 : index
    %c0_39 = arith.constant 0 : index
    %c36_40 = arith.constant 36 : index
    %58 = vector.load %arg9[%c0_38, %c0_39, %c36_40] : memref<1x8x384xf32, #tpu.memory_space<vmem>>, vector<1x8x288xf32>
    %59 = vector.shape_cast %58 : vector<1x8x288xf32> to vector<8x288xf32>
    %60 = vector.shape_cast %53 : vector<8x288xf32> to vector<1x8x288xf32>
    tpu.vector_store %arg9[%c0_38, %c0_39, %c36_40], %60 {strides = array<i32>} : memref<1x8x384xf32, #tpu.memory_space<vmem>>, vector<1x8x288xf32>,
    return
  }
  func.func @transform_0(%arg0: i32) -> (i32, i32, i32) {
    %c0_i32 = arith.constant 0 : i32
    %c0_i32_0 = arith.constant 0 : i32
    %c0_i32_1 = arith.constant 0 : i32
    return %arg0, %c0_i32, %c0_i32_0 : i32, i32, i32
  }
  func.func @transform_1(%arg0: i32) -> (i32, i32) {
    %c0_i32 = arith.constant 0 : i32
    %c0_i32_0 = arith.constant 0 : i32
    %c0_i32_1 = arith.constant 0 : i32
    return %c0_i32, %c0_i32_0 : i32, i32
  }
  func.func @transform_2(%arg0: i32) -> (i32, i32) {
    %c0_i32 = arith.constant 0 : i32
    %c0_i32_0 = arith.constant 0 : i32
    %c0_i32_1 = arith.constant 0 : i32
    return %c0_i32, %c0_i32_0 : i32, i32
  }
  func.func @transform_3(%arg0: i32) -> (i32, i32) {
    %c0_i32 = arith.constant 0 : i32
    %c0_i32_0 = arith.constant 0 : i32
    %c0_i32_1 = arith.constant 0 : i32
    return %c0_i32, %c0_i32_0 : i32, i32
  }
  func.func @transform_4(%arg0: i32) -> (i32, i32) {
    %c0_i32 = arith.constant 0 : i32
    %c0_i32_0 = arith.constant 0 : i32
    %c0_i32_1 = arith.constant 0 : i32
    return %c0_i32, %c0_i32_0 : i32, i32
  }
  func.func @transform_5(%arg0: i32) -> (i32, i32) {
    %c0_i32 = arith.constant 0 : i32
    %c0_i32_0 = arith.constant 0 : i32
    %c0_i32_1 = arith.constant 0 : i32
    return %c0_i32, %c0_i32_0 : i32, i32
  }
  func.func @transform_6(%arg0: i32) -> (i32, i32) {
    %c0_i32 = arith.constant 0 : i32
    %c0_i32_0 = arith.constant 0 : i32
    %c0_i32_1 = arith.constant 0 : i32
    return %c0_i32, %c0_i32_0 : i32, i32
  }
  func.func @transform_7(%arg0: i32) -> (i32, i32) {
    %c0_i32 = arith.constant 0 : i32
    %c0_i32_0 = arith.constant 0 : i32
    %c0_i32_1 = arith.constant 0 : i32
    return %c0_i32, %c0_i32_0 : i32, i32
  }
  func.func @transform_8(%arg0: i32) -> (i32, i32, i32) {
    %c0_i32 = arith.constant 0 : i32
    %c0_i32_0 = arith.constant 0 : i32
    %c0_i32_1 = arith.constant 0 : i32
    return %arg0, %c0_i32, %c0_i32_0 : i32, i32, i32
  }
}

</mosaic_0001>

<bundles_post_ra>
// kernel: down_old_forward.3
= control target key start
LH: loop header
LB: loop body
LE: loop exit
PB: predicated region body
PF: predicated region fallthrough
CT: control target
= control target key end

     0   :  { %s1259_s30 = smov 0   ;;  %s1458_s0 = inlined_call_operand.vmem [shape: f32[2,8,384], index: 0, kind: input, shape index: {}]   ;;  %s1459_s1 = inlined_call_operand.vmem [shape: bf16[8,72], index: 1, kind: input, shape index: {}]   ;;  %s1460_s2 = inlined_call_operand.vmem [shape: f32[8,1], index: 2, kind: input, shape index: {}]   ;;  %s1461_s3 = inlined_call_operand.vmem [shape: bf16[8,72], index: 3, kind: input, shape index: {}]   ;;  %s1462_s4 = inlined_call_operand.vmem [shape: f32[8,1], index: 4, kind: input, shape index: {}]   ;;  %s1463_s5 = inlined_call_operand.vmem [shape: bf16[8,8], index: 5, kind: input, shape index: {}]   ;;  %s1464_s6 = inlined_call_operand.vmem [shape: f32[8,1], index: 6, kind: input, shape index: {}]   ;;  %s1465_s7 = inlined_call_operand.vmem [shape: f32[1,80], index: 7, kind: input, shape index: {}]   ;;  %s1466_s8 = inlined_call_operand.vmem [shape: bf16[288,80], index: 8, kind: input, shape index: {}]   ;;  %s1467_s9 = inlined_call_operand.vmem [shape: f32[2,8,128], index: 9, kind: output, shape index: {}]  }
   0x1 LB: > { %s1006_s10 = sadd.s32 4294967295, %s1189_s30   ;;  %p1010_p0 = scmp.ge.s32.totalorder %s1189_s30, 1  ;;  %s1189_s30 = sphi %s1259_s30, %s19_s30  }
   0x2   : > { %p287_p1 = scmp.lt.s32.totalorder %s1189_s30, 3 }
   0x4   : > { %p288_p2 = pnand %p1010_p0, %p287_p1 }
   0x5   : > { %p322_p3 = scmp.lt.s32.totalorder (!%p288_p2), %s1006_s10, 1  ;;  %s1191_s15 = smov (!%p288_p2), 92  }
   0x6   : > { %291 = sbr.rel (%p288_p2) target bundleno = 1164 (0x48c), region = 56  ;;  %s1192_s16 = smov (!%p288_p2), 90  }
   0x7   : > { %s1193_s17 = smov (!%p288_p2), 91   ;;  %s1194_s18 = smov (!%p288_p2), 109  }
   0x8   : > { %s1195_s19 = smov (!%p288_p2), 108   ;;  %s1196_s20 = smov (!%p288_p2), 110  }
   0x9   : > { %s1197_s21 = smov (!%p288_p2), 126   ;;  %s1198_s22 = smov (!%p288_p2), 127  }
   0xa   : > { %s1199_s23 = smov (!%p288_p2), 111   ;;  %s1205_s24 = smov (!%p288_p2), 116  }
   0xb   : > { %s1469_s10 = smov (!%p322_p3, %s1006_s10), 1  ;;  %vm429_vm0 = vcmask 736256   ;;  %vm417_vm1 = vcmask 744448   ;;  %vm405_vm2 = vcmask 752640   ;;  %vm381_vm3 = vcmask 891904   ;;  %s1206_s25 = smov 117  }
   0xc   : > { %s1112_s11 = smul.u32 24, %s1469_s10  ;;  %vm393_vm4 = vcmask 883712   ;;  %vm369_vm5 = vcmask 900096   ;;  %vm357_vm6 = vcmask 1031168   ;;  %vm345_vm7 = vcmask 1039360   ;;  %s1207_s26 = smov 118  }
   0xd   : > { %vm529_vm8 = vcmask 1043456   ;;  %vm502_vm9 = vcmask 908288   ;;  %vm525_vm10 = vcmask 588800   ;;  %vm728_vm11 = vcmask 261120  }
   0xe   : > { %s326_s14 = scalar_lea.vmem %s1458_s0, %s1112_s11  ;;  %vm863_vm12 = vcmask 818336   ;;  %vm838_vm13 = vcmask 64512  }
   0xf   : > { %v1273_v0 = vld [vmem:[%s326_s14] sm:$0xff]  ;;  %v1275_v1 = vld [vmem:[%s326_s14 + $0x10] sm:$0xff]  ;;  %v1277_v2 = vld [vmem:[%s326_s14 + $0x8] sm:$0xff] }
  0x10   : > { %v1144_v3 = vpack.i.bf16 %v1273_v0, %v1275_v1  ;;  %401 = vrot.lane.b32.xlu2 %v1277_v2, %s1191_s15 }
  0x12   : > { %1145 = vrot.lane.b32.xlu1 %v1144_v3, %s1191_s15  ;;  %1140 = vrot.lane.b32.xlu0 %v1144_v3, %s1192_s16 }
  0x18   : > { %413 = vrot.lane.b32.xlu2 %v1277_v2, %s1193_s17 }
  0x1a   : > { %1150 = vrot.lane.b32.xlu1 %v1144_v3, %s1193_s17  ;;  %425 = vrot.lane.b32.xlu0 %v1277_v2, %s1192_s16 }
  0x20   : > { %377 = vrot.lane.b32.xlu2 %v1277_v2, %s1194_s18 }
  0x22   : > { %1160 = vrot.lane.b32.xlu1 %v1144_v3, %s1195_s19  ;;  %1155 = vrot.lane.b32.xlu0 %v1144_v3, %s1194_s18 }
  0x28   : > { %1170 = vrot.lane.b32.xlu2 %v1144_v3, %s1196_s20 }
  0x2a   : > { %1165 = vrot.lane.b32.xlu1 %v1144_v3, %s1197_s21  ;;  %389 = vrot.lane.b32.xlu0 %v1277_v2, %s1195_s19 }
  0x30   : > { %1175 = vrot.lane.b32.xlu2 %v1144_v3, %s1198_s22 }
  0x32   : > { %365 = vrot.lane.b32.xlu1 %v1277_v2, %s1196_s20  ;;  %353 = vrot.lane.b32.xlu0 %v1277_v2, %s1197_s21  ;;  %s1203_s20 = smov 107  }
  0x3a   : > { %341 = vrot.lane.b32.xlu0 %v1277_v2, %s1198_s22 }
  0x6a   : > { %v402_v4 = vpop.permute.xlu2 %401 }
  0x72   : > { %v414_v5 = vpop.permute.xlu2 %413 }
  0x7a   : > { %v378_v10 = vpop.permute.xlu2 %377 }
  0x82   : > { %v1171_v25 = vpop.permute.xlu2 %1170 }
  0x83   : > { %v1172_v37 = vunpack.i.l.bf16 %v1171_v25  ;;  %v1173_v50 = vunpack.i.h.bf16 %v1171_v25 }
  0x84   : > { %v1146_v6 = vpop.permute.xlu1 %1145  ;;  %v1141_v7 = vpop.permute.xlu0 %1140 }
  0x85   : > { %v1142_v8 = vunpack.i.l.bf16 %v1141_v7  ;;  %v1143_v11 = vunpack.i.h.bf16 %v1141_v7  ;;  %v1147_v14 = vunpack.i.l.bf16 %v1146_v6  ;;  %v1148_v22 = vunpack.i.h.bf16 %v1146_v6 }
  0x87   : > { %v449_v9 = vpack.c.bf16 %v1142_v8, %v1142_v8  ;;  %v406_v30 = vsel %vm405_vm2, %v1148_v22, %v402_v4  ;;  %v407_v31 = vsel %vm405_vm2, %v402_v4, %v1147_v14 }
  0x89   : > { %500 = vrot.lane.b32.xlu1 %v449_v9, %s1199_s23 }
  0x8a   : > { %v1176_v45 = vpop.permute.xlu2 %1175 }
  0x8b   : > { %v1177_v49 = vunpack.i.l.bf16 %v1176_v45  ;;  %v1178_v61 = vunpack.i.h.bf16 %v1176_v45  ;;  %v1108_v45 = vld [vmem:[%s1466_s8 + $0x70] sm:$0xff] }
  0x8c   : > { %v1151_v12 = vpop.permute.xlu1 %1150  ;;  %v426_v13 = vpop.permute.xlu0 %425 }
  0x8d   : > { %v1152_v15 = vunpack.i.l.bf16 %v1151_v12  ;;  %v430_v16 = vsel %vm429_vm0, %v1143_v11, %v426_v13  ;;  %v431_v17 = vsel %vm429_vm0, %v426_v13, %v1142_v8  ;;  %v1153_v20 = vunpack.i.h.bf16 %v1151_v12 }
  0x8e   : > { %v447_v18 = vpack.c.bf16 %v430_v16, %v430_v16  ;;  %v448_v19 = vpack.c.bf16 %v431_v17, %v431_v17  ;;  %v437_v52 = vpack.c.bf16 %v1177_v49, %v1275_v1  ;;  %v451_v16 = vld [vmem:[%s1460_s2] sm:$0xff]  ;;  %v1328_v17 = vld [vmem:[%s1466_s8 + $0x38] sm:$0xff] }
  0x8f   : > { %v446_v21 = vpack.c.bf16 %v1152_v15, %v1147_v14  ;;  %v418_v23 = vsel %vm417_vm1, %v1153_v20, %v414_v5  ;;  %v419_v24 = vsel %vm417_vm1, %v414_v5, %v1152_v15  ;;  %732 = vmatpush.bf16.msra.mxu3 %v1328_v17 }
  0x90   : > { %496 = vrot.lane.b32.xlu2 %v447_v18, %s1199_s23  ;;  %498 = vrot.lane.b32.xlu0 %v448_v19, %s1199_s23  ;;  %v444_v32 = vpack.c.bf16 %v418_v23, %v406_v30  ;;  %v445_v33 = vpack.c.bf16 %v419_v24, %v407_v31  ;;  %v1200_v18 = vmov 0   ;;  %v1334_v19 = vld [vmem:[%s1466_s8 + $0x30] sm:$0xff]  ;;  %v1342_v24 = vld [vmem:[%s1466_s8 + $0x28] sm:$0xff] }
  0x91   : > { %494 = vrot.lane.b32.xlu1 %v446_v21, %s1199_s23  ;;  %1180 = vset.pattern.permute.xlu2 %v1200_v18  ;;  %v1097_v31 = vld [vmem:[%s1466_s8 + $0x18] sm:$0xff] }
  0x92   : > { %1179 = vset.pattern.permute.xlu1 %v1200_v18  ;;  %1181 = vset.pattern.permute.xlu0 %v1200_v18 }
  0x93   : > { %733 = vmatpush.bf16.msra.mxu3 %v1334_v19 }
  0x94   : > { %v1161_v26 = vpop.permute.xlu1 %1160  ;;  %v1156_v27 = vpop.permute.xlu0 %1155 }
  0x95   : > { %v1162_v28 = vunpack.i.l.bf16 %v1161_v26  ;;  %v1157_v29 = vunpack.i.l.bf16 %v1156_v27  ;;  %v1158_v35 = vunpack.i.h.bf16 %v1156_v27  ;;  %v1163_v36 = vunpack.i.h.bf16 %v1161_v26  ;;  %v1348_v26 = vld [vmem:[%s1466_s8 + $0x20] sm:$0xff] }
  0x97   : > { %v443_v34 = vpack.c.bf16 %v1162_v28, %v1157_v29  ;;  %v382_v40 = vsel %vm381_vm3, %v1158_v35, %v378_v10  ;;  %v383_v42 = vsel %vm381_vm3, %v378_v10, %v1157_v29  ;;  %734 = vmatpush.bf16.msra.mxu3 %v1342_v24  ;;  %v1111_v35 = vld [vmem:[%s1466_s8 + $0x88] sm:$0xff] }
  0x98   : > { %490 = vrot.lane.b32.xlu2 %v444_v32, %s1199_s23  ;;  %492 = vrot.lane.b32.xlu0 %v445_v33, %s1199_s23  ;;  %v1096_v33 = vld [vmem:[%s1466_s8 + $0x10] sm:$0xff] }
  0x99   : > { %488 = vrot.lane.b32.xlu1 %v443_v34, %s1199_s23 }
  0x9b   : > { %735 = vmatpush.bf16.msra.mxu3 %v1348_v26 }
  0x9c   : > { %v1166_v38 = vpop.permute.xlu1 %1165  ;;  %v390_v39 = vpop.permute.xlu0 %389 }
  0x9d   : > { %v1167_v41 = vunpack.i.l.bf16 %v1166_v38  ;;  %v394_v43 = vsel %vm393_vm4, %v1163_v36, %v390_v39  ;;  %v395_v44 = vsel %vm393_vm4, %v390_v39, %v1162_v28  ;;  %v1168_v51 = vunpack.i.h.bf16 %v1166_v38  ;;  %v450_v39 = vld [vmem:[%s1459_s1] sm:$0xf] }
  0x9e   : > { %v441_v46 = vpack.c.bf16 %v394_v43, %v382_v40  ;;  %v442_v47 = vpack.c.bf16 %v395_v44, %v383_v42  ;;  %v1109_v40 = vld [vmem:[%s1466_s8 + $0x78] sm:$0xff] }
  0x9f   : > { %v440_v48 = vpack.c.bf16 %v1172_v37, %v1167_v41  ;;  %736 = vmatpush.bf16.msra.mxu3 %v1097_v31 }
  0xa0   : > { %484 = vrot.lane.b32.xlu2 %v441_v46, %s1199_s23  ;;  %486 = vrot.lane.b32.xlu0 %v442_v47, %s1199_s23  ;;  %v1107_v46 = vld [vmem:[%s1466_s8 + $0x68] sm:$0xff]  ;;  %v1106_v47 = vld [vmem:[%s1466_s8 + $0x60] sm:$0xff] }
  0xa1   : > { %482 = vrot.lane.b32.xlu1 %v440_v48, %s1199_s23  ;;  %v1105_v48 = vld [vmem:[%s1466_s8 + $0x58] sm:$0xff] }
  0xa3   : > { %737 = vmatpush.bf16.msra.mxu3 %v1096_v33 }
  0xa4   : > { %v366_v53 = vpop.permute.xlu1 %365  ;;  %v354_v54 = vpop.permute.xlu0 %353 }
  0xa5   : > { %v370_v55 = vsel %vm369_vm5, %v1173_v50, %v366_v53  ;;  %v371_v56 = vsel %vm369_vm5, %v366_v53, %v1172_v37  ;;  %v358_v57 = vsel %vm357_vm6, %v1168_v51, %v354_v54  ;;  %v359_v58 = vsel %vm357_vm6, %v354_v54, %v1167_v41  ;;  %v1095_v50 = vld [vmem:[%s1466_s8 + $0x8] sm:$0xff]  ;;  %v1094_v53 = vld [vmem:[%s1466_s8] sm:$0xff] }
  0xa6   : > { %v438_v59 = vpack.c.bf16 %v370_v55, %v358_v57  ;;  %v439_v60 = vpack.c.bf16 %v371_v56, %v359_v58  ;;  %v1103_v51 = vld [vmem:[%s1466_s8 + $0x48] sm:$0xff]  ;;  %v1102_v54 = vld [vmem:[%s1466_s8 + $0x40] sm:$0xff]  ;;  %v772_v55 = vpack.c.bf16 %v1277_v2, %v1277_v2  ;;  %v773_v56 = vpack.c.bf16 %v1275_v1, %v1275_v1 }
  0xa7   : > { %738 = vmatpush.bf16.msra.mxu3 %v1095_v50  ;;  %v771_v57 = vpack.c.bf16 %v1273_v0, %v1273_v0 }
  0xa8   : > { %478 = vrot.lane.b32.xlu2 %v438_v59, %s1199_s23  ;;  %480 = vrot.lane.b32.xlu0 %v439_v60, %s1199_s23 }
  0xa9   : > { %476 = vrot.lane.b32.xlu1 %v437_v52, %s1199_s23  ;;  %v1110_v52 = vld [vmem:[%s1466_s8 + $0x80] sm:$0xff] }
  0xab   : > { %739 = vmatpush.bf16.msra.mxu3 %v1094_v53 }
  0xac   : > { %v342_v62 = vpop.permute.xlu0 %341 }
  0xad   : > { %v346_v63 = vsel %vm345_vm7, %v1178_v61, %v342_v62  ;;  %v347_v3 = vsel %vm345_vm7, %v342_v62, %v1177_v49  ;;  %v1104_v49 = vld [vmem:[%s1466_s8 + $0x50] sm:$0xff] }
  0xae   : > { %v435_v4 = vpack.c.bf16 %v346_v63, %v1273_v0  ;;  %v436_v5 = vpack.c.bf16 %v347_v3, %v1277_v2 }
  0xaf   : > { %804 = vmatpush.bf16.msrb.mxu3 %v1109_v40 }
  0xb0   : > { %472 = vrot.lane.b32.xlu2 %v435_v4, %s1199_s23  ;;  %474 = vrot.lane.b32.xlu0 %v436_v5, %s1199_s23  ;;  %s1204_s23 = smov 106  }
  0xb1   : > { %454 = vperm.xlu1 %1179, %v451_v16  }
  0xb3   : > { %805 = vmatpush.bf16.msrb.mxu3 %v1108_v45 }
  0xb7   : > { %806 = vmatpush.bf16.msrb.mxu3 %v1107_v46 }
  0xb8   : > { %779 = vrot.lane.b32.xlu0 %v772_v55, %s1191_s15  ;;  %777 = vrot.lane.b32.xlu2 %v771_v57, %s1191_s15 }
  0xb9   : > { %781 = vrot.lane.b32.xlu1 %v773_v56, %s1191_s15  ;;  %s1012_s15 = sshll.u32 %s1469_s10, 3  ;;  %s1202_s10 = smov 20  }
  0xba   : > { %s1423_s18 = scalar_lea.vmem %s1467_s9, %s1012_s15 }
  0xbb   : > { %807 = vmatpush.bf16.msrb.mxu3 %v1106_v47 }
  0xbf   : > { %808 = vmatpush.bf16.msrb.mxu3 %v1105_v48 }
  0xc3   : > { %809 = vmatpush.bf16.msrb.mxu3 %v1104_v49 }
  0xc7   : > { %810 = vmatpush.bf16.msrb.mxu3 %v1103_v51 }
  0xcb   : > { %811 = vmatpush.bf16.msrb.mxu3 %v1102_v54 }
  0xea   : > { %v497_v6 = vpop.permute.xlu2 %496 }
  0xf2   : > { %v491_v13 = vpop.permute.xlu2 %490 }
  0xfa   : > { %v485_v25 = vpop.permute.xlu2 %484 }
  0xfb   : > { %v501_v7 = vpop.permute.xlu1 %500 }
  0xfc   : > { %v537_v8 = vsel %vm529_vm8, %v501_v7, 0 }
  0xfd   : > { %568 = vmatpush.bf16.msra.mxu2 %v537_v8 }
 0x102   : > { %v499_v9 = vpop.permute.xlu0 %498  ;;  %v479_v32 = vpop.permute.xlu2 %478 }
 0x103   : > { %v495_v10 = vpop.permute.xlu1 %494  ;;  %v511_v11 = vsel %vm502_vm9, %v497_v6, %v499_v9  ;;  %v512_v12 = vsel %vm502_vm9, %v499_v9, %v501_v7 }
 0x104   : > { %569 = vmatpush.bf16.msra.mxu2 %v495_v10  ;;  %v531_v14 = vsel %vm529_vm8, %v511_v11, 0  ;;  %v534_v15 = vsel %vm529_vm8, %v512_v12, 0 }
 0x105   : > { %542 = vmatpush.bf16.msra.mxu0 %v531_v14  ;;  %555 = vmatpush.bf16.msra.mxu1 %v534_v15  ;;  %v1201_v14 = vmov 0.0  }
 0x106   : > { %858 = vst [vmem:[#allocation2] sm:$0xff] %v1201_v14 }
 0x107   : > { %947 = vst [vmem:[%s1423_s18] sm:$0xff] %v1201_v14 }
 0x10a   : > { %v493_v20 = vpop.permute.xlu0 %492  ;;  %v473_v41 = vpop.permute.xlu2 %472 }
 0x10b   : > { %v489_v21 = vpop.permute.xlu1 %488  ;;  %v509_v22 = vsel %vm502_vm9, %v491_v13, %v493_v20  ;;  %v510_v23 = vsel %vm502_vm9, %v493_v20, %v495_v10 }
 0x10c   : > { %543 = vmatpush.bf16.msra.mxu0 %v509_v22  ;;  %556 = vmatpush.bf16.msra.mxu1 %v510_v23 }
 0x10d   : > { %570 = vmatpush.bf16.msra.mxu2 %v489_v21 }
 0x112   : > { %v487_v27 = vpop.permute.xlu0 %486  ;;  %v778_v11 = vpop.permute.xlu2 %777 }
 0x113   : > { %v483_v28 = vpop.permute.xlu1 %482  ;;  %v507_v29 = vsel %vm502_vm9, %v485_v25, %v487_v27  ;;  %v508_v30 = vsel %vm502_vm9, %v487_v27, %v489_v21 }
 0x114   : > { %544 = vmatpush.bf16.msra.mxu0 %v507_v29  ;;  %557 = vmatpush.bf16.msra.mxu1 %v508_v30 }
 0x115   : > { %571 = vmatpush.bf16.msra.mxu2 %v483_v28 }
 0x11a   : > { %v481_v34 = vpop.permute.xlu0 %480 }
 0x11b   : > { %v477_v36 = vpop.permute.xlu1 %476  ;;  %v505_v37 = vsel %vm502_vm9, %v479_v32, %v481_v34  ;;  %v506_v38 = vsel %vm502_vm9, %v481_v34, %v483_v28 }
 0x11c   : > { %545 = vmatpush.bf16.msra.mxu0 %v505_v37  ;;  %558 = vmatpush.bf16.msra.mxu1 %v506_v38 }
 0x11d   : > { %572 = vmatpush.bf16.msra.mxu2 %v477_v36 }
 0x120   : > { %1015 = vmatmul.msk.bf16.vlgmr.msra.gmra.mxu2 %vm525_vm10, %v450_v39 }
 0x121   : > { %764 = vmatpush.bf16.msrb.mxu2 %v1111_v35 }
 0x122   : > { %v475_v42 = vpop.permute.xlu0 %474 }
 0x123   : > { %v503_v43 = vsel %vm502_vm9, %v473_v41, %v475_v42  ;;  %v504_v44 = vsel %vm502_vm9, %v475_v42, %v477_v36  ;;  %v455_v0 = vpop.permute.xlu1 %454  ;;  %v830_v36 = vld [vmem:[%s1463_s5] sm:$0xf] }
 0x124   : > { %546 = vmatpush.bf16.msra.mxu0 %v503_v43  ;;  %559 = vmatpush.bf16.msra.mxu1 %v504_v44 }
 0x125   : > { %765 = vmatpush.bf16.msrb.mxu2 %v1110_v52 }
 0x127   : > { %1013 = vmatmul.msk.bf16.vlgmr.msra.gmra.mxu0 %vm525_vm10, %v450_v39  ;;  %1014 = vmatmul.msk.bf16.vlgmr.msra.gmra.mxu1 %vm525_vm10, %v450_v39 }
 0x128   : > { %745 = vmatpush.bf16.msrb.mxu0 %v1109_v40  ;;  %823 = vmatpush.bf16.msrb.mxu1 %v1111_v35 }
 0x129   : > { %791 = vmatpush.bf16.msra.mxu2 %v1328_v17 }
 0x12a   : > { %v780_v10 = vpop.permute.xlu0 %779 }
 0x12b   : > { %v784_v12 = vsel %vm405_vm2, %v778_v11, %v780_v10  ;;  %v782_v13 = vpop.permute.xlu1 %781 }
 0x12c   : > { %746 = vmatpush.bf16.msrb.mxu0 %v1108_v45  ;;  %824 = vmatpush.bf16.msrb.mxu1 %v1110_v52  ;;  %v785_v15 = vsel %vm405_vm2, %v780_v10, %v782_v13 }
 0x12d   : > { %792 = vmatpush.bf16.msra.mxu2 %v1334_v19 }
 0x130   : > { %747 = vmatpush.bf16.msrb.mxu0 %v1107_v46 }
 0x131   : > { %793 = vmatpush.bf16.msra.mxu2 %v1342_v24 }
 0x134   : > { %748 = vmatpush.bf16.msrb.mxu0 %v1106_v47 }
 0x135   : > { %794 = vmatpush.bf16.msra.mxu2 %v1348_v26 }
 0x137   : > { %1089 = vmatmul.msk.bf16.vlgmr.msrb.gmra.mxu1 %vm728_vm11, %v782_v13 }
 0x138   : > { %749 = vmatpush.bf16.msrb.mxu0 %v1105_v48 }
 0x139   : > { %795 = vmatpush.bf16.msra.mxu2 %v1097_v31 }
 0x13c   : > { %750 = vmatpush.bf16.msrb.mxu0 %v1104_v49  ;;  %v832_v49 = vld [vmem:[%s1464_s6] sm:$0xff] }
 0x13d   : > { %796 = vmatpush.bf16.msra.mxu2 %v1096_v33 }
 0x140   : > { %751 = vmatpush.bf16.msrb.mxu0 %v1103_v51 }
 0x141   : > { %797 = vmatpush.bf16.msra.mxu2 %v1095_v50 }
 0x144   : > { %752 = vmatpush.bf16.msrb.mxu0 %v1102_v54  ;;  %v897_v54 = vld [vmem:[%s1462_s4] sm:$0xff] }
 0x145   : > { %798 = vmatpush.bf16.msra.mxu2 %v1094_v53 }
 0x1a3   : > { %v574_v1 = vpop.f32.mrf.mxu2 }
 0x1a4   : > { %v575_v2 = vadd.f32 %v574_v1, %v455_v0  ;;  %v548_v58 = vpop.f32.mrf.mxu0  ;;  %v561_v59 = vpop.f32.mrf.mxu1 }
 0x1a5   : > { %v549_v60 = vadd.f32 %v548_v58, %v455_v0  ;;  %v562_v61 = vadd.f32 %v561_v59, %v455_v0 }
 0x1a6   : > { %v580_v62 = vmax.f32 %v575_v2, 0.0  ;;  %v896_v2 = vld [vmem:[%s1461_s3] sm:$0xf] }
 0x1a7   : > { %v578_v63 = vmax.f32 %v549_v60, 0.0  ;;  %v579_v3 = vmax.f32 %v562_v61, 0.0 }
 0x1a8   : > { %v619_v4 = vpack.c.bf16 %v580_v62, %v580_v62 }
 0x1a9   : > { %v618_v5 = vpack.c.bf16 %v579_v3, %v579_v3  ;;  %v617_v6 = vpack.c.bf16 %v578_v63, %v578_v63  ;;  %v1182_v3 = vld [vmem:[%s1465_s7] ss:$0 sm:$0xff] }
 0x1aa   : > { %1088 = vmatmul.msk.bf16.vlgmr.msrb.gmra.mxu2 %vm728_vm11, %v619_v4 }
 0x1ab   : > { %v576_v7 = vpop.f32.mrf.mxu2  ;;  %740 = vmatmul.bf16.vlgmr.msra.gmra.mxu3 %v617_v6  ;;  %753 = vmatmul.bf16.vlgmr.msrb.gmra.mxu0 %v618_v5 }
 0x1ac   : > { %v550_v8 = vpop.f32.mrf.mxu0  ;;  %v563_v9 = vpop.f32.mrf.mxu1 }
 0x1b4   : > { %v826_v29 = vpop.f32.mrf.mxu1 }
 0x1ba   : > { %799 = vmatmul.bf16.vlgmr.msra.gmra.mxu2 %v784_v12 }
 0x1bb   : > { %812 = vmatmul.bf16.vlgmr.msrb.gmra.mxu3 %v785_v15 }
 0x1bc   : > { %v828_v35 = vpop.f32.mrf.mxu1 }
 0x228   : > { %v754_v16 = vpop.f32.mrf.mxu0 }
 0x22d   : > { %v767_v17 = vpop.f32.mrf.mxu2 }
 0x22e   : > { %v741_v18 = vpop.f32.mrf.mxu3 }
 0x22f   : > { %v755_v19 = vadd.f32 %v754_v16, %v741_v18 }
 0x230   : > { %v756_v20 = vpop.f32.mrf.mxu0 }
 0x231   : > { %v768_v21 = vadd.f32 %v767_v17, %v755_v19 }
 0x233   : > { %860 = vrot.lane.b32.xlu2 %v768_v21, %s1202_s10 }
 0x235   : > { %v769_v22 = vpop.f32.mrf.mxu2 }
 0x236   : > { %v743_v23 = vpop.f32.mrf.mxu3 }
 0x23d   : > { %v800_v26 = vpop.f32.mrf.mxu2 }
 0x23e   : > { %v813_v27 = vpop.f32.mrf.mxu3 }
 0x23f   : > { %v814_v28 = vadd.f32 %v813_v27, %v800_v26 }
 0x241   : > { %v827_v30 = vadd.f32 %v826_v29, %v814_v28 }
 0x243   : > { %v831_v31 = vpack.c.bf16 %v827_v30, %v827_v30 }
 0x245   : > { %v843_v32 = vsel %vm529_vm8, %v831_v31, 0  ;;  %v802_v33 = vpop.f32.mrf.mxu2 }
 0x246   : > { %852 = vmatpush.bf16.msra.mxu0 %v843_v32  ;;  %v815_v34 = vpop.f32.mrf.mxu3 }
 0x249   : > { %1090 = vmatmul.msk.bf16.vlgmr.msra.gmra.mxu0 %vm838_vm13, %v830_v36 }
 0x28d   : > { %v861_v24 = vpop.permute.xlu2 %860 }
 0x28e   : > { %864 = vst.msk [vmem:[#allocation2] sm:$0xff] %vm863_vm12, %v861_v24 }
 0x295   : > { %v865_v25 = vld [vmem:[#allocation2] sm:$0xff] }
 0x296   : > { %885 = vrot.lane.b32.xlu2 %v865_v25, %s1203_s20  ;;  %882 = vrot.lane.b32.xlu1 %v865_v25, %s1195_s19 }
 0x297   : > { %888 = vrot.lane.b32.xlu0 %v865_v25, %s1204_s23 }
 0x29e   : > { %870 = vrot.lane.b32.xlu2 %v865_v25, %s1197_s21  ;;  %879 = vrot.lane.b32.xlu1 %v865_v25, %s1205_s24 }
 0x29f   : > { %876 = vrot.lane.b32.xlu0 %v865_v25, %s1206_s25 }
 0x2a6   : > { %867 = vrot.lane.b32.xlu1 %v865_v25, %s1198_s22  ;;  %s1208_s22 = smov 119  }
 0x2a7   : > { %873 = vrot.lane.b32.xlu0 %v865_v25, %s1207_s26 }
 0x2c6   : > { %v854_v53 = vpop.f32.mrf.mxu0 }
 0x2ce   : > { %v856_v55 = vpop.f32.mrf.mxu0 }
 0x2f0   : > { %v886_v37 = vpop.permute.xlu2 %885 }
 0x2f8   : > { %v871_v46 = vpop.permute.xlu2 %870 }
 0x308   : > { %v883_v38 = vpop.permute.xlu1 %882 }
 0x309   : > { %v894_v39 = vpack.c.bf16 %v886_v37, %v883_v38  ;;  %v889_v40 = vpop.permute.xlu0 %888 }
 0x30a   : > { %v895_v41 = vpack.c.bf16 %v889_v40, %v889_v40 }
 0x30b   : > { %914 = vrot.lane.b32.xlu0 %v894_v39, %s1208_s22 }
 0x30c   : > { %916 = vrot.lane.b32.xlu2 %v895_v41, %s1208_s22 }
 0x310   : > { %v880_v42 = vpop.permute.xlu1 %879 }
 0x311   : > { %v877_v43 = vpop.permute.xlu0 %876 }
 0x312   : > { %v893_v44 = vpack.c.bf16 %v880_v42, %v877_v43 }
 0x314   : > { %912 = vrot.lane.b32.xlu1 %v893_v44, %s1208_s22 }
 0x318   : > { %v868_v45 = vpop.permute.xlu1 %867 }
 0x319   : > { %v891_v47 = vpack.c.bf16 %v868_v45, %v865_v25  ;;  %v874_v48 = vpop.permute.xlu0 %873 }
 0x31a   : > { %v892_v50 = vpack.c.bf16 %v874_v48, %v871_v46 }
 0x31b   : > { %908 = vrot.lane.b32.xlu0 %v891_v47, %s1208_s22 }
 0x31c   : > { %835 = vperm.xlu1 %1179, %v832_v49   ;;  %910 = vrot.lane.b32.xlu2 %v892_v50, %s1208_s22 }
 0x324   : > { %900 = vperm.xlu2 %1180, %v897_v54  }
 0x366   : > { %v917_v51 = vpop.permute.xlu2 %916 }
 0x367   : > { %v926_v52 = vsel %vm529_vm8, %v917_v51, 0 }
 0x368   : > { %931 = vmatpush.bf16.msra.mxu1 %v926_v52 }
 0x376   : > { %v911_v0 = vpop.permute.xlu2 %910 }
 0x37d   : > { %v915_v56 = vpop.permute.xlu0 %914 }
 0x37e   : > { %932 = vmatpush.bf16.msra.mxu1 %v915_v56  ;;  %v901_v59 = vpop.permute.xlu2 %900 }
 0x386   : > { %v913_v57 = vpop.permute.xlu1 %912 }
 0x387   : > { %933 = vmatpush.bf16.msra.mxu1 %v913_v57 }
 0x38b   : > { %934 = vmatpush.bf16.msra.mxu1 %v911_v0 }
 0x38d   : > { %v909_v1 = vpop.permute.xlu0 %908 }
 0x38e   : > { %v836_v58 = vpop.permute.xlu1 %835 }
 0x38f   : > { %935 = vmatpush.bf16.msra.mxu1 %v909_v1  ;;  %v855_v61 = vadd.f32 %v854_v53, %v836_v58 }
 0x392   : > { %1091 = vmatmul.msk.bf16.vlgmr.msra.gmra.mxu1 %vm525_vm10, %v896_v2 }
 0x40f   : > { %v937_v60 = vpop.f32.mrf.mxu1 }
 0x410   : > { %v938_v62 = vadd.f32 %v937_v60, %v901_v59 }
 0x412   : > { %v941_v63 = vadd.f32 %v938_v62, %v855_v61 }
 0x414   : > { %v942_v4 = vmax.f32 %v941_v63, 0.0 }
 0x416   : > { %v946_v5 = vmul.f32 %v1182_v3, %v942_v4 }
 0x417   : > { %v939_v6 = vpop.f32.mrf.mxu1 }
 0x418   : > { %949 = vrot.lane.b32.xlu0 %v946_v5, %s1202_s10 }
 0x48a   : > { %v950_v7 = vpop.permute.xlu0 %949 }
 0x48b   : > { %952 = vst.msk [vmem:[%s1423_s18] sm:$0xff] %vm863_vm12, %v950_v7 }
 0x48c PF: > { %s19_s30 = sadd.s32 1, %s1189_s30  }
 0x48d   : > { %p16_p4 = scmp.ge.s32.totalorder %s19_s30, 4  }
 0x48f   :  { %18 = sbr.rel (!%p16_p4) target bundleno = 1 (0x1), region = 86 }

// kernel: down_old_forward.2
= control target key start
LH: loop header
LB: loop body
LE: loop exit
PB: predicated region body
PF: predicated region fallthrough
CT: control target
= control target key end

     0   :  { %s1167_s27 = smov 0   ;;  %s1432_s0 = inlined_call_operand.vmem [shape: f32[2,8,384], index: 0, kind: input, shape index: {}]   ;;  %s1433_s1 = inlined_call_operand.vmem [shape: bf16[8,72], index: 1, kind: input, shape index: {}]   ;;  %s1434_s2 = inlined_call_operand.vmem [shape: f32[8,1], index: 2, kind: input, shape index: {}]   ;;  %s1435_s3 = inlined_call_operand.vmem [shape: bf16[8,72], index: 3, kind: input, shape index: {}]   ;;  %s1436_s4 = inlined_call_operand.vmem [shape: f32[8,1], index: 4, kind: input, shape index: {}]   ;;  %s1437_s5 = inlined_call_operand.vmem [shape: bf16[8,8], index: 5, kind: input, shape index: {}]   ;;  %s1438_s6 = inlined_call_operand.vmem [shape: f32[8,1], index: 6, kind: input, shape index: {}]   ;;  %s1439_s7 = inlined_call_operand.vmem [shape: f32[1,288], index: 7, kind: input, shape index: {}]   ;;  %s1440_s8 = inlined_call_operand.vmem [shape: f32[2,8,384], index: 8, kind: output, shape index: {}]  }
   0x1 LB: > { %s981_s28 = sadd.s32 4294967295, %s1108_s27   ;;  %p985_p0 = scmp.ge.s32.totalorder %s1108_s27, 1  ;;  %s1108_s27 = sphi %s1167_s27, %s18_s27  }
   0x2   : > { %p262_p1 = scmp.lt.s32.totalorder %s1108_s27, 3 }
   0x4   : > { %p263_p2 = pnand %p985_p0, %p262_p1 }
   0x5   : > { %p296_p3 = scmp.lt.s32.totalorder (!%p263_p2), %s981_s28, 1  ;;  %s1110_s11 = smov (!%p263_p2), 92  }
   0x6   : > { %266 = sbr.rel (%p263_p2) target bundleno = 1081 (0x439), region = 52  ;;  %s1111_s12 = smov (!%p263_p2), 90  }
   0x7   : > { %s1112_s13 = smov (!%p263_p2), 109   ;;  %s1113_s14 = smov (!%p263_p2), 91  }
   0x8   : > { %s1114_s15 = smov (!%p263_p2), 108   ;;  %s1115_s16 = smov (!%p263_p2), 126  }
   0x9   : > { %s1116_s17 = smov (!%p263_p2), 110   ;;  %s1117_s18 = smov (!%p263_p2), 127  }
   0xa   : > { %s1118_s19 = smov (!%p263_p2), 111   ;;  %s1121_s26 = smov (!%p263_p2), 36  }
   0xb   : > { %s1442_s28 = smov (!%p296_p3, %s981_s28), 1  ;;  %vm404_vm0 = vcmask 736256   ;;  %vm392_vm1 = vcmask 744448   ;;  %vm380_vm2 = vcmask 752640   ;;  %vm368_vm3 = vcmask 883712  }
   0xc   : > { %s999_s29 = smul.u32 24, %s1442_s28  ;;  %vm356_vm4 = vcmask 891904   ;;  %vm344_vm5 = vcmask 900096   ;;  %vm332_vm6 = vcmask 1031168   ;;  %vm320_vm7 = vcmask 1039360  }
   0xd   : > { %vm504_vm8 = vcmask 1043456   ;;  %vm477_vm9 = vcmask 908288   ;;  %vm500_vm10 = vcmask 588800   ;;  %vm658_vm11 = vcmask 1047840  }
   0xe   : > { %s300_s10 = scalar_lea.vmem %s1432_s0, %s999_s29  ;;  %vm652_vm12 = vcmask 293888   ;;  %vm661_vm13 = vcmask 556032   ;;  %vm588_vm14 = vcmask 64512  }
   0xf   : > { %v1183_v0 = vld [vmem:[%s300_s10] sm:$0xff]  ;;  %v1185_v1 = vld [vmem:[%s300_s10 + $0x10] sm:$0xff]  ;;  %v1192_v3 = vld [vmem:[%s300_s10 + $0x8] sm:$0xff] }
  0x10   : > { %v1025_v2 = vpack.i.bf16 %v1183_v0, %v1185_v1 }
  0x12   : > { %1026 = vrot.lane.b32.xlu1 %v1025_v2, %s1110_s11  ;;  %1021 = vrot.lane.b32.xlu0 %v1025_v2, %s1111_s12 }
  0x13   : > { %1036 = vrot.lane.b32.xlu2 %v1025_v2, %s1112_s13 }
  0x1a   : > { %1031 = vrot.lane.b32.xlu1 %v1025_v2, %s1113_s14  ;;  %400 = vrot.lane.b32.xlu0 %v1192_v3, %s1111_s12 }
  0x1b   : > { %1041 = vrot.lane.b32.xlu2 %v1025_v2, %s1114_s15 }
  0x22   : > { %388 = vrot.lane.b32.xlu1 %v1192_v3, %s1113_s14  ;;  %376 = vrot.lane.b32.xlu0 %v1192_v3, %s1110_s11 }
  0x23   : > { %1046 = vrot.lane.b32.xlu2 %v1025_v2, %s1115_s16 }
  0x2a   : > { %352 = vrot.lane.b32.xlu1 %v1192_v3, %s1112_s13  ;;  %1051 = vrot.lane.b32.xlu0 %v1025_v2, %s1116_s17 }
  0x2b   : > { %364 = vrot.lane.b32.xlu2 %v1192_v3, %s1114_s15 }
  0x32   : > { %328 = vrot.lane.b32.xlu1 %v1192_v3, %s1115_s16  ;;  %1056 = vrot.lane.b32.xlu0 %v1025_v2, %s1117_s18 }
  0x33   : > { %340 = vrot.lane.b32.xlu2 %v1192_v3, %s1116_s17 }
  0x3a   : > { %316 = vrot.lane.b32.xlu0 %v1192_v3, %s1117_s18 }
  0x6d   : > { %v1037_v4 = vpop.permute.xlu2 %1036 }
  0x6e   : > { %v1038_v21 = vunpack.i.l.bf16 %v1037_v4  ;;  %v1039_v36 = vunpack.i.h.bf16 %v1037_v4 }
  0x75   : > { %v1042_v7 = vpop.permute.xlu2 %1041 }
  0x76   : > { %v1043_v22 = vunpack.i.l.bf16 %v1042_v7  ;;  %v1044_v34 = vunpack.i.h.bf16 %v1042_v7 }
  0x78   : > { %v418_v33 = vpack.c.bf16 %v1043_v22, %v1038_v21 }
  0x7d   : > { %v1047_v19 = vpop.permute.xlu2 %1046 }
  0x7e   : > { %v1048_v37 = vunpack.i.l.bf16 %v1047_v19  ;;  %v1049_v50 = vunpack.i.h.bf16 %v1047_v19 }
  0x84   : > { %v1027_v5 = vpop.permute.xlu1 %1026  ;;  %v1022_v6 = vpop.permute.xlu0 %1021 }
  0x85   : > { %v1023_v8 = vunpack.i.l.bf16 %v1022_v6  ;;  %v1024_v10 = vunpack.i.h.bf16 %v1022_v6  ;;  %v1028_v13 = vunpack.i.l.bf16 %v1027_v5  ;;  %v1029_v23 = vunpack.i.h.bf16 %v1027_v5  ;;  %v365_v35 = vpop.permute.xlu2 %364 }
  0x86   : > { %v369_v38 = vsel %vm368_vm3, %v1044_v34, %v365_v35  ;;  %v370_v41 = vsel %vm368_vm3, %v365_v35, %v1043_v22 }
  0x87   : > { %v424_v9 = vpack.c.bf16 %v1023_v8, %v1023_v8 }
  0x89   : > { %475 = vrot.lane.b32.xlu1 %v424_v9, %s1118_s19 }
  0x8c   : > { %v1032_v11 = vpop.permute.xlu1 %1031  ;;  %v401_v12 = vpop.permute.xlu0 %400 }
  0x8d   : > { %v1033_v14 = vunpack.i.l.bf16 %v1032_v11  ;;  %v405_v15 = vsel %vm404_vm0, %v1024_v10, %v401_v12  ;;  %v406_v16 = vsel %vm404_vm0, %v401_v12, %v1023_v8  ;;  %v1034_v24 = vunpack.i.h.bf16 %v1032_v11  ;;  %v341_v49 = vpop.permute.xlu2 %340 }
  0x8e   : > { %v422_v17 = vpack.c.bf16 %v405_v15, %v405_v15  ;;  %v423_v18 = vpack.c.bf16 %v406_v16, %v406_v16 }
  0x8f   : > { %v421_v20 = vpack.c.bf16 %v1033_v14, %v1028_v13 }
  0x90   : > { %471 = vrot.lane.b32.xlu0 %v422_v17, %s1118_s19  ;;  %v426_v17 = vld [vmem:[%s1434_s2] sm:$0xff] }
  0x91   : > { %469 = vrot.lane.b32.xlu2 %v421_v20, %s1118_s19  ;;  %473 = vrot.lane.b32.xlu1 %v423_v18, %s1118_s19  ;;  %v1119_v18 = vmov 0  }
  0x92   : > { %1060 = vset.pattern.permute.xlu1 %v1119_v18  ;;  %1101 = vset.pattern.permute.xlu0 %v1119_v18 }
  0x94   : > { %v389_v25 = vpop.permute.xlu1 %388  ;;  %v377_v26 = vpop.permute.xlu0 %376 }
  0x95   : > { %v393_v27 = vsel %vm392_vm1, %v1034_v24, %v389_v25  ;;  %v394_v28 = vsel %vm392_vm1, %v389_v25, %v1033_v14  ;;  %v381_v29 = vsel %vm380_vm2, %v1029_v23, %v377_v26  ;;  %v382_v30 = vsel %vm380_vm2, %v377_v26, %v1028_v13  ;;  %v425_v24 = vld [vmem:[%s1433_s1] sm:$0xf] }
  0x96   : > { %v419_v31 = vpack.c.bf16 %v393_v27, %v381_v29  ;;  %v420_v32 = vpack.c.bf16 %v394_v28, %v382_v30 }
  0x98   : > { %465 = vrot.lane.b32.xlu0 %v419_v31, %s1118_s19 }
  0x99   : > { %463 = vrot.lane.b32.xlu2 %v418_v33, %s1118_s19  ;;  %467 = vrot.lane.b32.xlu1 %v420_v32, %s1118_s19 }
  0x9c   : > { %v353_v39 = vpop.permute.xlu1 %352  ;;  %v1052_v40 = vpop.permute.xlu0 %1051 }
  0x9d   : > { %v357_v42 = vsel %vm356_vm4, %v1039_v36, %v353_v39  ;;  %v358_v43 = vsel %vm356_vm4, %v353_v39, %v1038_v21  ;;  %v1053_v44 = vunpack.i.l.bf16 %v1052_v40  ;;  %v1054_v48 = vunpack.i.h.bf16 %v1052_v40  ;;  %v1276_v39 = vld [vmem:[%s1439_s7] sm:$0x7] }
  0x9e   : > { %v416_v45 = vpack.c.bf16 %v369_v38, %v357_v42  ;;  %v417_v46 = vpack.c.bf16 %v370_v41, %v358_v43  ;;  %v559_v42 = vperm.slane %v1276_v39, 2 }
  0x9f   : > { %v415_v47 = vpack.c.bf16 %v1053_v44, %v1048_v37  ;;  %v345_v51 = vsel %vm344_vm5, %v1054_v48, %v341_v49  ;;  %v346_v54 = vsel %vm344_vm5, %v341_v49, %v1053_v44 }
  0xa0   : > { %459 = vrot.lane.b32.xlu0 %v416_v45, %s1118_s19 }
  0xa1   : > { %457 = vrot.lane.b32.xlu2 %v415_v47, %s1118_s19  ;;  %461 = vrot.lane.b32.xlu1 %v417_v46, %s1118_s19 }
  0xa4   : > { %v329_v52 = vpop.permute.xlu1 %328  ;;  %v1057_v53 = vpop.permute.xlu0 %1056 }
  0xa5   : > { %v333_v55 = vsel %vm332_vm6, %v1049_v50, %v329_v52  ;;  %v334_v56 = vsel %vm332_vm6, %v329_v52, %v1048_v37  ;;  %v1058_v57 = vunpack.i.l.bf16 %v1057_v53  ;;  %v1059_v61 = vunpack.i.h.bf16 %v1057_v53 }
  0xa6   : > { %v413_v58 = vpack.c.bf16 %v345_v51, %v333_v55  ;;  %v414_v59 = vpack.c.bf16 %v346_v54, %v334_v56  ;;  %v1120_v37 = vmov 0.0   ;;  %v558_v50 = vperm.slane %v1276_v39, 1 }
  0xa7   : > { %v412_v60 = vpack.c.bf16 %v1058_v57, %v1185_v1  ;;  %640 = vst [vmem:[#allocation2] sm:$0xff] %v1120_v37  ;;  %v557_v51 = vperm.slane %v1276_v39, 0 }
  0xa8   : > { %453 = vrot.lane.b32.xlu0 %v413_v58, %s1118_s19  ;;  %642 = vst [vmem:[#allocation2 + $0x10] sm:$0xff] %v1120_v37 }
  0xa9   : > { %451 = vrot.lane.b32.xlu2 %v412_v60, %s1118_s19  ;;  %455 = vrot.lane.b32.xlu1 %v414_v59, %s1118_s19 }
  0xac   : > { %v317_v62 = vpop.permute.xlu0 %316 }
  0xad   : > { %v321_v63 = vsel %vm320_vm7, %v1059_v61, %v317_v62  ;;  %v322_v2 = vsel %vm320_vm7, %v317_v62, %v1058_v57 }
  0xae   : > { %v410_v4 = vpack.c.bf16 %v321_v63, %v1183_v0  ;;  %v411_v5 = vpack.c.bf16 %v322_v2, %v1192_v3 }
  0xb0   : > { %449 = vrot.lane.b32.xlu0 %v411_v5, %s1118_s19  ;;  %v568_v5 = vpack.c.bf16 %v1192_v3, %v1192_v3 }
  0xb1   : > { %447 = vrot.lane.b32.xlu2 %v410_v4, %s1118_s19  ;;  %429 = vperm.xlu1 %1060, %v426_v17  }
  0xeb   : > { %v470_v6 = vpop.permute.xlu2 %469 }
  0xf3   : > { %v464_v7 = vpop.permute.xlu2 %463 }
  0xfb   : > { %v476_v8 = vpop.permute.xlu1 %475  ;;  %v458_v11 = vpop.permute.xlu2 %457 }
  0xfc   : > { %v512_v9 = vsel %vm504_vm8, %v476_v8, 0 }
  0xfd   : > { %543 = vmatpush.bf16.msra.mxu2 %v512_v9 }
 0x101   : > { %544 = vmatpush.bf16.msra.mxu2 %v470_v6 }
 0x102   : > { %v472_v10 = vpop.permute.xlu0 %471 }
 0x103   : > { %v474_v12 = vpop.permute.xlu1 %473  ;;  %v452_v23 = vpop.permute.xlu2 %451 }
 0x104   : > { %v486_v13 = vsel %vm477_vm9, %v472_v10, %v474_v12  ;;  %v487_v14 = vsel %vm477_vm9, %v474_v12, %v476_v8  ;;  %v569_v8 = vpack.c.bf16 %v1185_v1, %v1185_v1 }
 0x105   : > { %545 = vmatpush.bf16.msra.mxu2 %v464_v7  ;;  %v506_v15 = vsel %vm504_vm8, %v486_v13, 0  ;;  %v509_v16 = vsel %vm504_vm8, %v487_v14, 0 }
 0x106   : > { %517 = vmatpush.bf16.msra.mxu0 %v506_v15  ;;  %530 = vmatpush.bf16.msra.mxu1 %v509_v16 }
 0x109   : > { %546 = vmatpush.bf16.msra.mxu2 %v458_v11 }
 0x10a   : > { %v466_v19 = vpop.permute.xlu0 %465 }
 0x10b   : > { %v468_v20 = vpop.permute.xlu1 %467  ;;  %v448_v33 = vpop.permute.xlu2 %447 }
 0x10c   : > { %v484_v21 = vsel %vm477_vm9, %v466_v19, %v468_v20  ;;  %v485_v22 = vsel %vm477_vm9, %v468_v20, %v470_v6  ;;  %v567_v6 = vpack.c.bf16 %v1183_v0, %v1183_v0 }
 0x10d   : > { %518 = vmatpush.bf16.msra.mxu0 %v484_v21  ;;  %531 = vmatpush.bf16.msra.mxu1 %v485_v22 }
 0x10e   : > { %547 = vmatpush.bf16.msra.mxu2 %v452_v23 }
 0x111   : > { %990 = vmatmul.msk.bf16.vlgmr.msra.gmra.mxu2 %vm500_vm10, %v425_v24 }
 0x112   : > { %v460_v25 = vpop.permute.xlu0 %459 }
 0x113   : > { %v462_v26 = vpop.permute.xlu1 %461 }
 0x114   : > { %v482_v27 = vsel %vm477_vm9, %v460_v25, %v462_v26  ;;  %v483_v28 = vsel %vm477_vm9, %v462_v26, %v464_v7 }
 0x115   : > { %519 = vmatpush.bf16.msra.mxu0 %v482_v27  ;;  %532 = vmatpush.bf16.msra.mxu1 %v483_v28 }
 0x11a   : > { %v454_v29 = vpop.permute.xlu0 %453 }
 0x11b   : > { %v456_v30 = vpop.permute.xlu1 %455 }
 0x11c   : > { %v480_v31 = vsel %vm477_vm9, %v454_v29, %v456_v30  ;;  %v481_v32 = vsel %vm477_vm9, %v456_v30, %v458_v11 }
 0x11d   : > { %520 = vmatpush.bf16.msra.mxu0 %v480_v31  ;;  %533 = vmatpush.bf16.msra.mxu1 %v481_v32 }
 0x122   : > { %v450_v34 = vpop.permute.xlu0 %449 }
 0x123   : > { %v478_v35 = vsel %vm477_vm9, %v448_v33, %v450_v34  ;;  %v479_v36 = vsel %vm477_vm9, %v450_v34, %v452_v23  ;;  %v430_v38 = vpop.permute.xlu1 %429 }
 0x124   : > { %521 = vmatpush.bf16.msra.mxu0 %v478_v35  ;;  %534 = vmatpush.bf16.msra.mxu1 %v479_v36 }
 0x127   : > { %988 = vmatmul.msk.bf16.vlgmr.msra.gmra.mxu0 %vm500_vm10, %v425_v24  ;;  %989 = vmatmul.msk.bf16.vlgmr.msra.gmra.mxu1 %vm500_vm10, %v425_v24 }
 0x194   : > { %v549_v40 = vpop.f32.mrf.mxu2 }
 0x195   : > { %v550_v41 = vadd.f32 %v549_v40, %v430_v38 }
 0x197   : > { %v555_v43 = vmax.f32 %v550_v41, 0.0 }
 0x199   : > { %v565_v44 = vmul.f32 %v559_v42, %v555_v43 }
 0x19b   : > { %650 = vrot.lane.b32.xlu1 %v565_v44, %s1121_s26 }
 0x19c   : > { %v551_v45 = vpop.f32.mrf.mxu2 }
 0x1a4   : > { %v523_v46 = vpop.f32.mrf.mxu0  ;;  %v536_v47 = vpop.f32.mrf.mxu1 }
 0x1a5   : > { %v524_v48 = vadd.f32 %v523_v46, %v430_v38  ;;  %v537_v49 = vadd.f32 %v536_v47, %v430_v38 }
 0x1a7   : > { %v553_v52 = vmax.f32 %v524_v48, 0.0  ;;  %v554_v53 = vmax.f32 %v537_v49, 0.0 }
 0x1a9   : > { %v564_v54 = vmul.f32 %v558_v50, %v554_v53  ;;  %v563_v55 = vmul.f32 %v557_v51, %v553_v52 }
 0x1ab   : > { %648 = vrot.lane.b32.xlu0 %v564_v54, %s1121_s26  ;;  %646 = vrot.lane.b32.xlu2 %v563_v55, %s1121_s26 }
 0x1ac   : > { %v538_v56 = vpop.f32.mrf.mxu1  ;;  %v525_v57 = vpop.f32.mrf.mxu0 }
 0x205   : > { %v647_v58 = vpop.permute.xlu2 %646 }
 0x206   : > { %659 = vst.msk [vmem:[#allocation2] sm:$0xff] %vm658_vm11, %v647_v58 }
 0x20d   : > { %v1291_v59 = vld [vmem:[#allocation2] sm:$0xff]  ;;  %v651_v60 = vpop.permute.xlu1 %650 }
 0x20e   : > { %713 = vrot.lane.b32.xlu1 %v1291_v59, %s1114_s15  ;;  %735 = vrot.lane.b32.xlu0 %v1291_v59, %s1113_s14 }
 0x20f   : > { %746 = vrot.lane.b32.xlu2 %v1291_v59, %s1111_s12 }
 0x216   : > { %702 = vrot.lane.b32.xlu0 %v1291_v59, %s1112_s13 }
 0x217   : > { %724 = vrot.lane.b32.xlu2 %v1291_v59, %s1110_s11 }
 0x21d   : > { %v649_v61 = vpop.permute.xlu0 %648 }
 0x21e   : > { %v1304_v62 = vsel %vm652_vm12, %v647_v58, %v649_v61  ;;  %v654_v63 = vsel %vm652_vm12, %v649_v61, %v651_v60 }
 0x21f   : > { %662 = vst.msk [vmem:[#allocation2 + $0x10] sm:$0xff] %vm661_vm13, %v654_v63 }
 0x226   : > { %v1308_v2 = vld [vmem:[#allocation2 + $0x10] sm:$0xff] }
 0x227   : > { %v1071_v4 = vpack.i.bf16 %v1308_v2, %v1304_v62 }
 0x229   : > { %1072 = vrot.lane.b32.xlu1 %v1071_v4, %s1113_s14  ;;  %1067 = vrot.lane.b32.xlu0 %v1071_v4, %s1110_s11 }
 0x22a   : > { %1062 = vrot.lane.b32.xlu2 %v1071_v4, %s1111_s12 }
 0x231   : > { %691 = vrot.lane.b32.xlu1 %v1291_v59, %s1116_s17  ;;  %1077 = vrot.lane.b32.xlu0 %v1071_v4, %s1112_s13 }
 0x232   : > { %669 = vrot.lane.b32.xlu2 %v1291_v59, %s1117_s18 }
 0x239   : > { %1082 = vrot.lane.b32.xlu1 %v1071_v4, %s1114_s15  ;;  %680 = vrot.lane.b32.xlu0 %v1291_v59, %s1115_s16 }
 0x23a   : > { %1092 = vrot.lane.b32.xlu2 %v1071_v4, %s1116_s17 }
 0x241   : > { %1087 = vrot.lane.b32.xlu1 %v1071_v4, %s1115_s16  ;;  %579 = vrot.lane.b32.xlu0 %v567_v6, %s1110_s11 }
 0x242   : > { %1097 = vrot.lane.b32.xlu2 %v1071_v4, %s1117_s18  ;;  %s1407_s18 = scalar_lea.vmem %s1440_s8, %s999_s29 }
 0x243   : > { %906 = vst [vmem:[%s1407_s18] sm:$0xff] %v1120_v37 }
 0x244   : > { %908 = vst [vmem:[%s1407_s18 + $0x10] sm:$0xff] %v1120_v37 }
 0x249   : > { %581 = vrot.lane.b32.xlu1 %v568_v5, %s1110_s11 }
 0x24a   : > { %583 = vrot.lane.b32.xlu2 %v569_v8, %s1110_s11 }
 0x269   : > { %v747_v7 = vpop.permute.xlu2 %746 }
 0x271   : > { %v725_v9 = vpop.permute.xlu2 %724 }
 0x280   : > { %v736_v3 = vpop.permute.xlu0 %735  ;;  %v714_v0 = vpop.permute.xlu1 %713 }
 0x284   : > { %v1063_v10 = vpop.permute.xlu2 %1062 }
 0x285   : > { %v1064_v11 = vunpack.i.l.bf16 %v1063_v10  ;;  %v1065_v14 = vunpack.i.h.bf16 %v1063_v10 }
 0x287   : > { %v752_v12 = vsel %vm404_vm0, %v747_v7, %v1064_v11  ;;  %v771_v15 = vpack.c.bf16 %v1065_v14, %v1065_v14  ;;  %v753_v31 = vsel %vm404_vm0, %v1064_v11, %v1065_v14 }
 0x288   : > { %v769_v13 = vpack.c.bf16 %v752_v12, %v752_v12  ;;  %v703_v16 = vpop.permute.xlu0 %702  ;;  %v770_v33 = vpack.c.bf16 %v753_v31, %v753_v31  ;;  %v773_v12 = vld [vmem:[%s1436_s4] sm:$0xff] }
 0x28a   : > { %818 = vrot.lane.b32.xlu1 %v769_v13, %s1118_s19 }
 0x28c   : > { %v670_v29 = vpop.permute.xlu2 %669 }
 0x292   : > { %822 = vrot.lane.b32.xlu1 %v771_v15, %s1118_s19 }
 0x294   : > { %v1093_v36 = vpop.permute.xlu2 %1092 }
 0x295   : > { %v1095_v52 = vunpack.i.h.bf16 %v1093_v36  ;;  %v1094_v53 = vunpack.i.l.bf16 %v1093_v36 }
 0x297   : > { %v698_v60 = vsel %vm344_vm5, %v1094_v53, %v1095_v52 }
 0x29b   : > { %v1073_v17 = vpop.permute.xlu1 %1072  ;;  %v1068_v18 = vpop.permute.xlu0 %1067 }
 0x29c   : > { %v1075_v1 = vunpack.i.h.bf16 %v1073_v17  ;;  %v1074_v19 = vunpack.i.l.bf16 %v1073_v17  ;;  %v1070_v20 = vunpack.i.h.bf16 %v1068_v18  ;;  %v1069_v21 = vunpack.i.l.bf16 %v1068_v18  ;;  %v1098_v57 = vpop.permute.xlu2 %1097 }
 0x29d   : > { %v1100_v8 = vunpack.i.h.bf16 %v1098_v57 }
 0x29e   : > { %v768_v22 = vpack.c.bf16 %v1075_v1, %v1070_v20  ;;  %v731_v23 = vsel %vm380_vm2, %v1069_v21, %v1070_v20  ;;  %v742_v24 = vsel %vm392_vm1, %v1074_v19, %v1075_v1  ;;  %v730_v25 = vsel %vm380_vm2, %v725_v9, %v1069_v21  ;;  %v566_v1 = vld [vmem:[%s1437_s5] sm:$0xf] }
 0x29f   : > { %v767_v26 = vpack.c.bf16 %v742_v24, %v731_v23  ;;  %v741_v27 = vsel %vm392_vm1, %v736_v3, %v1074_v19  ;;  %v1099_v9 = vunpack.i.l.bf16 %v1098_v57  ;;  %v759_v11 = vpack.c.bf16 %v1100_v8, %v1308_v2 }
 0x2a0   : > { %816 = vrot.lane.b32.xlu0 %v768_v22, %s1118_s19  ;;  %v766_v28 = vpack.c.bf16 %v741_v27, %v730_v25  ;;  %v570_v25 = vld [vmem:[%s1438_s6] sm:$0xff] }
 0x2a1   : > { %814 = vrot.lane.b32.xlu2 %v767_v26, %s1118_s19  ;;  %v676_v10 = vsel %vm320_vm7, %v1099_v9, %v1100_v8  ;;  %v675_v3 = vsel %vm320_vm7, %v670_v29, %v1099_v9 }
 0x2a2   : > { %812 = vrot.lane.b32.xlu1 %v766_v28, %s1118_s19  ;;  %v758_v13 = vpack.c.bf16 %v676_v10, %v1304_v62  ;;  %v757_v14 = vpack.c.bf16 %v675_v3, %v1291_v59 }
 0x2a3   : > { %v692_v30 = vpop.permute.xlu1 %691  ;;  %v1078_v32 = vpop.permute.xlu0 %1077 }
 0x2a4   : > { %v1080_v34 = vunpack.i.h.bf16 %v1078_v32  ;;  %v1079_v35 = vunpack.i.l.bf16 %v1078_v32  ;;  %v697_v61 = vsel %vm344_vm5, %v692_v30, %v1094_v53  ;;  %v584_v17 = vpop.permute.xlu2 %583 }
 0x2a5   : > { %v599_v59 = vsel %vm504_vm8, %v584_v17, 0 }
 0x2a6   : > { %v709_v43 = vsel %vm356_vm4, %v1079_v35, %v1080_v34  ;;  %v708_v46 = vsel %vm356_vm4, %v703_v16, %v1079_v35  ;;  %634 = vmatpush.bf16.msrb.mxu0 %v599_v59 }
 0x2a8   : > { %820 = vrot.lane.b32.xlu0 %v770_v33, %s1118_s19 }
 0x2a9   : > { %993 = vmatmul.msk.bf16.vlgmr.msrb.gmra.mxu0 %vm588_vm14, %v566_v1 }
 0x2ab   : > { %v1083_v38 = vpop.permute.xlu1 %1082  ;;  %v681_v58 = vpop.permute.xlu0 %680 }
 0x2ac   : > { %v1085_v40 = vunpack.i.h.bf16 %v1083_v38  ;;  %v1084_v41 = vunpack.i.l.bf16 %v1083_v38 }
 0x2ae   : > { %v765_v44 = vpack.c.bf16 %v1085_v40, %v1080_v34  ;;  %v720_v45 = vsel %vm368_vm3, %v1084_v41, %v1085_v40  ;;  %v719_v47 = vsel %vm368_vm3, %v714_v0, %v1084_v41 }
 0x2af   : > { %v764_v48 = vpack.c.bf16 %v720_v45, %v709_v43  ;;  %v763_v49 = vpack.c.bf16 %v719_v47, %v708_v46 }
 0x2b0   : > { %810 = vrot.lane.b32.xlu0 %v765_v44, %s1118_s19 }
 0x2b1   : > { %808 = vrot.lane.b32.xlu2 %v764_v48, %s1118_s19  ;;  %806 = vrot.lane.b32.xlu1 %v763_v49, %s1118_s19  ;;  %v772_v49 = vld [vmem:[%s1435_s3] sm:$0xf] }
 0x2b3   : > { %v1088_v54 = vpop.permute.xlu1 %1087  ;;  %v580_v0 = vpop.permute.xlu0 %579 }
 0x2b4   : > { %v1090_v55 = vunpack.i.h.bf16 %v1088_v54  ;;  %v1089_v56 = vunpack.i.l.bf16 %v1088_v54 }
 0x2b6   : > { %v762_v63 = vpack.c.bf16 %v1095_v52, %v1090_v55  ;;  %v687_v4 = vsel %vm332_vm6, %v1089_v56, %v1090_v55  ;;  %v686_v5 = vsel %vm332_vm6, %v681_v58, %v1089_v56 }
 0x2b7   : > { %v761_v6 = vpack.c.bf16 %v698_v60, %v687_v4  ;;  %v760_v7 = vpack.c.bf16 %v697_v61, %v686_v5 }
 0x2b8   : > { %804 = vrot.lane.b32.xlu0 %v762_v63, %s1118_s19 }
 0x2b9   : > { %802 = vrot.lane.b32.xlu2 %v761_v6, %s1118_s19  ;;  %800 = vrot.lane.b32.xlu1 %v760_v7, %s1118_s19 }
 0x2bb   : > { %v582_v15 = vpop.permute.xlu1 %581 }
 0x2bc   : > { %v586_v2 = vsel %vm380_vm2, %v580_v0, %v582_v15  ;;  %v587_v62 = vsel %vm380_vm2, %v582_v15, %v584_v17 }
 0x2bd   : > { %v593_v16 = vsel %vm504_vm8, %v586_v2, 0  ;;  %v596_v18 = vsel %vm504_vm8, %v587_v62, 0 }
 0x2be   : > { %608 = vmatpush.bf16.msra.mxu3 %v593_v16 }
 0x2c0   : > { %798 = vrot.lane.b32.xlu0 %v759_v11, %s1118_s19 }
 0x2c1   : > { %796 = vrot.lane.b32.xlu2 %v758_v13, %s1118_s19  ;;  %776 = vperm.xlu1 %1060, %v773_v12  }
 0x2c2   : > { %621 = vmatpush.bf16.msrb.mxu3 %v596_v18 }
 0x2c3   : > { %991 = vmatmul.msk.bf16.vlgmr.msra.gmra.mxu3 %vm588_vm14, %v566_v1 }
 0x2c8   : > { %573 = vperm.xlu0 %1101, %v570_v25  }
 0x2c9   : > { %794 = vrot.lane.b32.xlu2 %v757_v14, %s1118_s19 }
 0x2d3   : > { %992 = vmatmul.msk.bf16.vlgmr.msrb.gmra.mxu3 %vm588_vm14, %v566_v1 }
 0x2fb   : > { %v815_v22 = vpop.permute.xlu2 %814 }
 0x2fc   : > { %v819_v19 = vpop.permute.xlu1 %818 }
 0x304   : > { %v823_v20 = vpop.permute.xlu1 %822 }
 0x305   : > { %v856_v21 = vsel %vm504_vm8, %v823_v20, 0 }
 0x306   : > { %887 = vmatpush.bf16.msra.mxu3 %v856_v21 }
 0x30b   : > { %v809_v23 = vpop.permute.xlu2 %808 }
 0x312   : > { %v817_v24 = vpop.permute.xlu0 %816 }
 0x313   : > { %888 = vmatpush.bf16.msra.mxu3 %v817_v24  ;;  %v803_v26 = vpop.permute.xlu2 %802  ;;  %v831_v34 = vsel %vm477_vm9, %v815_v22, %v817_v24 }
 0x314   : > { %v813_v28 = vpop.permute.xlu1 %812 }
 0x315   : > { %v830_v33 = vsel %vm477_vm9, %v813_v28, %v815_v22 }
 0x31a   : > { %v821_v27 = vpop.permute.xlu0 %820 }
 0x31b   : > { %v832_v29 = vsel %vm477_vm9, %v819_v19, %v821_v27  ;;  %v833_v30 = vsel %vm477_vm9, %v821_v27, %v823_v20  ;;  %v797_v36 = vpop.permute.xlu2 %796 }
 0x31c   : > { %v850_v31 = vsel %vm504_vm8, %v832_v29, 0  ;;  %v853_v32 = vsel %vm504_vm8, %v833_v30, 0 }
 0x31d   : > { %861 = vmatpush.bf16.msrb.mxu1 %v850_v31  ;;  %874 = vmatpush.bf16.msrb.mxu2 %v853_v32 }
 0x321   : > { %862 = vmatpush.bf16.msrb.mxu1 %v830_v33  ;;  %875 = vmatpush.bf16.msrb.mxu2 %v831_v34 }
 0x322   : > { %v811_v35 = vpop.permute.xlu0 %810 }
 0x323   : > { %v807_v38 = vpop.permute.xlu1 %806  ;;  %889 = vmatpush.bf16.msra.mxu3 %v811_v35  ;;  %v829_v40 = vsel %vm477_vm9, %v809_v23, %v811_v35  ;;  %v795_v47 = vpop.permute.xlu2 %794 }
 0x324   : > { %v828_v41 = vsel %vm477_vm9, %v807_v38, %v809_v23  ;;  %v824_v48 = vsel %vm477_vm9, %v795_v47, %v797_v36 }
 0x325   : > { %863 = vmatpush.bf16.msrb.mxu1 %v828_v41  ;;  %876 = vmatpush.bf16.msrb.mxu2 %v829_v40 }
 0x326   : > { %v636_v58 = vpop.f32.mrf.mxu0 }
 0x32a   : > { %v805_v43 = vpop.permute.xlu0 %804 }
 0x32b   : > { %v801_v44 = vpop.permute.xlu1 %800  ;;  %890 = vmatpush.bf16.msra.mxu3 %v805_v43  ;;  %v827_v45 = vsel %vm477_vm9, %v803_v26, %v805_v43 }
 0x32c   : > { %877 = vmatpush.bf16.msrb.mxu2 %v827_v45  ;;  %v826_v46 = vsel %vm477_vm9, %v801_v44, %v803_v26 }
 0x32d   : > { %864 = vmatpush.bf16.msrb.mxu1 %v826_v46 }
 0x32e   : > { %v638_v60 = vpop.f32.mrf.mxu0 }
 0x331   : > { %865 = vmatpush.bf16.msrb.mxu1 %v824_v48 }
 0x332   : > { %v799_v52 = vpop.permute.xlu0 %798 }
 0x333   : > { %891 = vmatpush.bf16.msra.mxu3 %v799_v52  ;;  %v825_v53 = vsel %vm477_vm9, %v797_v36, %v799_v52  ;;  %v777_v63 = vpop.permute.xlu1 %776 }
 0x334   : > { %994 = vmatmul.msk.bf16.vlgmr.msrb.gmra.mxu1 %vm500_vm10, %v772_v49  ;;  %878 = vmatpush.bf16.msrb.mxu2 %v825_v53 }
 0x336   : > { %996 = vmatmul.msk.bf16.vlgmr.msra.gmra.mxu3 %vm500_vm10, %v772_v49 }
 0x337   : > { %995 = vmatmul.msk.bf16.vlgmr.msrb.gmra.mxu2 %vm500_vm10, %v772_v49 }
 0x33a   : > { %v574_v61 = vpop.permute.xlu0 %573 }
 0x33b   : > { %v637_v9 = vadd.f32 %v636_v58, %v574_v61 }
 0x346   : > { %v610_v54 = vpop.f32.mrf.mxu3 }
 0x347   : > { %v611_v5 = vadd.f32 %v610_v54, %v574_v61 }
 0x34e   : > { %v612_v55 = vpop.f32.mrf.mxu3 }
 0x356   : > { %v623_v56 = vpop.f32.mrf.mxu3 }
 0x357   : > { %v624_v11 = vadd.f32 %v623_v56, %v574_v61 }
 0x35e   : > { %v625_v57 = vpop.f32.mrf.mxu3 }
 0x3b1   : > { %v867_v4 = vpop.f32.mrf.mxu1 }
 0x3b2   : > { %v868_v6 = vadd.f32 %v867_v4, %v777_v63 }
 0x3b4   : > { %v897_v7 = vadd.f32 %v868_v6, %v611_v5 }
 0x3b6   : > { %v900_v8 = vmax.f32 %v897_v7, 0.0 }
 0x3b8   : > { %v903_v10 = vmul.f32 %v900_v8, %v557_v51 }
 0x3b9   : > { %v893_v12 = vpop.f32.mrf.mxu3  ;;  %v869_v37 = vpop.f32.mrf.mxu1 }
 0x3ba   : > { %v894_v13 = vadd.f32 %v893_v12, %v777_v63  ;;  %v880_v3 = vpop.f32.mrf.mxu2  ;;  %912 = vrot.lane.b32.xlu2 %v903_v10, %s1121_s26 }
 0x3bb   : > { %v881_v14 = vadd.f32 %v880_v3, %v777_v63 }
 0x3bc   : > { %v899_v15 = vadd.f32 %v894_v13, %v637_v9 }
 0x3bd   : > { %v898_v0 = vadd.f32 %v881_v14, %v624_v11 }
 0x3be   : > { %v902_v2 = vmax.f32 %v899_v15, 0.0 }
 0x3bf   : > { %v901_v16 = vmax.f32 %v898_v0, 0.0 }
 0x3c0   : > { %v905_v17 = vmul.f32 %v902_v2, %v559_v42 }
 0x3c1   : > { %v904_v51 = vmul.f32 %v901_v16, %v558_v50  ;;  %v895_v62 = vpop.f32.mrf.mxu3 }
 0x3c2   : > { %v882_v18 = vpop.f32.mrf.mxu2  ;;  %916 = vrot.lane.b32.xlu2 %v905_v17, %s1121_s26 }
 0x3c3   : > { %914 = vrot.lane.b32.xlu1 %v904_v51, %s1121_s26 }
 0x414   : > { %v913_v1 = vpop.permute.xlu2 %912 }
 0x415   : > { %923 = vst.msk [vmem:[%s1407_s18] sm:$0xff] %vm658_vm11, %v913_v1 }
 0x41c   : > { %v917_v59 = vpop.permute.xlu2 %916 }
 0x435   : > { %v915_v19 = vpop.permute.xlu1 %914 }
 0x436   : > { %v918_v20 = vsel %vm652_vm12, %v913_v1, %v915_v19  ;;  %v919_v21 = vsel %vm652_vm12, %v915_v19, %v917_v59 }
 0x437   : > { %924 = vst [vmem:[%s1407_s18 + $0x8] sm:$0xff] %v918_v20 }
 0x438   : > { %925 = vst.msk [vmem:[%s1407_s18 + $0x10] sm:$0xff] %vm661_vm13, %v919_v21 }
 0x439 PF: > { %s18_s27 = sadd.s32 1, %s1108_s27  }
 0x43a   : > { %p15_p4 = scmp.ge.s32.totalorder %s18_s27, 4  }
 0x43c   :  { %17 = sbr.rel (!%p15_p4) target bundleno = 1 (0x1), region = 82 }

</bundles_post_ra>
